<compile_context>
chip_gen: v7x
topology: tpu7x:2x2x1
jax: 0.10.0
libtpu: 0.0.40
codegen_flags: <defaults>
</compile_context>

<pallas_src>
import functools
import math

import jax
import jax.numpy as jnp
from jax import lax
from jax.experimental import pallas as pl
from jax.experimental.pallas import tpu as pltpu

ACT_DTYPE = jnp.bfloat16      # storage dtype for weights + inter-kernel activations
LN_EPS = 1e-5

# Tile caps (safe on all generations; on v6e ROW_TILE_CAP=512 gives ~85% of HBM roofline,
# keep 256 on v7x/v5e where scoped VMEM is smaller).
ROW_TILE_CAP = 256
COL_TILE_CAP = 512


def _row_tile(m):
    return m if m <= ROW_TILE_CAP else ROW_TILE_CAP


def _col_tile(n):
    return n if n <= COL_TILE_CAP else COL_TILE_CAP


# ------------------------------- layer norm ---------------------------------

def _ln(y, g, b):
    # PyTorch LayerNorm: biased variance, eps=1e-5.  f32 math.
    mean = jnp.mean(y, axis=-1, keepdims=True)
    yc = y - mean
    var = jnp.mean(yc * yc, axis=-1, keepdims=True)
    return yc * lax.rsqrt(var + LN_EPS) * g + b


def _layernorm_kernel(x_ref, g_ref, b_ref, o_ref):
    y = x_ref[...].astype(jnp.float32)
    o_ref[...] = _ln(y, g_ref[...], b_ref[...]).astype(o_ref.dtype)


def layernorm(x, g, b):
    # x: (M, D) bf16 -> (M, D) bf16
    M, D = x.shape
    tm = _row_tile(M)
    return pl.pallas_call(
        _layernorm_kernel,
        out_shape=jax.ShapeDtypeStruct((M, D), ACT_DTYPE),
        grid=(pl.cdiv(M, tm),),
        in_specs=[
            pl.BlockSpec((tm, D), lambda i: (i, 0)),
            pl.BlockSpec((1, D), lambda i: (0, 0)),
            pl.BlockSpec((1, D), lambda i: (0, 0)),
        ],
        out_specs=pl.BlockSpec((tm, D), lambda i: (i, 0)),
        compiler_params=pltpu.CompilerParams(dimension_semantics=("parallel",)),
    )(x, g, b)


# ----------------------------- vocab projection ------------------------------

def _linear_kernel(x_ref, w_ref, b_ref, o_ref):
    y = jnp.dot(x_ref[...], w_ref[...], preferred_element_type=jnp.float32) + b_ref[...]
    o_ref[...] = y.astype(o_ref.dtype)


def linear(x, w, b, out_dtype=jnp.float32):
    # x: (M, K) bf16, w: (K, N) bf16, b: (1, N) f32 -> (M, N)
    # Grid order (N-tiles outer, M-tiles inner) -> each (K, tn) weight block is DMA'd once
    # while the small (tm, K) activation block streams (weight-read-once ordering).
    M, K = x.shape
    N = w.shape[1]
    tm, tn = _row_tile(M), _col_tile(N)
    return pl.pallas_call(
        _linear_kernel,
        out_shape=jax.ShapeDtypeStruct((M, N), out_dtype),
        grid=(pl.cdiv(N, tn), pl.cdiv(M, tm)),
        in_specs=[
            pl.BlockSpec((tm, K), lambda j, i: (i, 0)),
            pl.BlockSpec((K, tn), lambda j, i: (0, j)),
            pl.BlockSpec((1, tn), lambda j, i: (0, j)),
        ],
        out_specs=pl.BlockSpec((tm, tn), lambda j, i: (i, j)),
        compiler_params=pltpu.CompilerParams(
            dimension_semantics=("parallel", "parallel")),
    )(x, w, b)


# ------------------------ fused attention (per batch, head) ------------------

def _attn_core(q, k, v, mask, scale):
    # q: (Sq, dh) f32, k/v: (Sk, dh) f32, mask: (Sq, Sk) f32 or None
    s = jnp.einsum("qd,kd->qk", q.astype(ACT_DTYPE), k.astype(ACT_DTYPE),
                   preferred_element_type=jnp.float32) * scale
    if mask is not None:
        s = s + mask
    m = jnp.max(s, axis=-1, keepdims=True)
    p = jnp.exp(s - m)
    denom = jnp.sum(p, axis=-1, keepdims=True)
    attn = p * pl.reciprocal(denom, approx=True)
    return jnp.dot(attn.astype(ACT_DTYPE), v.astype(ACT_DTYPE),
                   preferred_element_type=jnp.float32)          # (Sq, dh) f32


def _self_attn_kernel(*refs, scale, has_mask):
    # One (batch, head) per grid step.  QKV projection fused (per-head weight slices).
    if has_mask:
        x_ref, wq_ref, wk_ref, wv_ref, bq_ref, bk_ref, bv_ref, mask_ref, o_ref = refs
        mask = mask_ref[...]
    else:
        x_ref, wq_ref, wk_ref, wv_ref, bq_ref, bk_ref, bv_ref, o_ref = refs
        mask = None
    x = x_ref[0]                                                      # (S, D) bf16
    q = jnp.dot(x, wq_ref[0], preferred_element_type=jnp.float32) + bq_ref[0]
    k = jnp.dot(x, wk_ref[0], preferred_element_type=jnp.float32) + bk_ref[0]
    v = jnp.dot(x, wv_ref[0], preferred_element_type=jnp.float32) + bv_ref[0]
    o_ref[0, 0] = _attn_core(q, k, v, mask, scale).astype(o_ref.dtype)


def _cross_attn_kernel(x_ref, mem_ref, wq_ref, wk_ref, wv_ref,
                       bq_ref, bk_ref, bv_ref, o_ref, *, scale):
    q = jnp.dot(x_ref[0], wq_ref[0], preferred_element_type=jnp.float32) + bq_ref[0]
    k = jnp.dot(mem_ref[0], wk_ref[0], preferred_element_type=jnp.float32) + bk_ref[0]
    v = jnp.dot(mem_ref[0], wv_ref[0], preferred_element_type=jnp.float32) + bv_ref[0]
    o_ref[0, 0] = _attn_core(q, k, v, None, scale).astype(o_ref.dtype)


def fused_self_attention(x, p, mask, nhead):
    # x: (B, S, D) bf16;  per-head weights p["wq"/"wk"/"wv"]: (H, D, dh) bf16,
    # biases (H, 1, dh) f32.  Returns per-head outputs (B, H, S, dh) bf16.
    B, S, D = x.shape
    H = nhead
    dh = D // H
    scale = 1.0 / math.sqrt(dh)
    has_mask = mask is not None
    kernel = functools.partial(_self_attn_kernel, scale=scale, has_mask=has_mask)
    in_specs = [
        pl.BlockSpec((1, S, D), lambda b, h: (b, 0, 0)),
        pl.BlockSpec((1, D, dh), lambda b, h: (h, 0, 0)),
        pl.BlockSpec((1, D, dh), lambda b, h: (h, 0, 0)),
        pl.BlockSpec((1, D, dh), lambda b, h: (h, 0, 0)),
        pl.BlockSpec((1, 1, dh), lambda b, h: (h, 0, 0)),
        pl.BlockSpec((1, 1, dh), lambda b, h: (h, 0, 0)),
        pl.BlockSpec((1, 1, dh), lambda b, h: (h, 0, 0)),
    ]
    args = [x, p["wq"], p["wk"], p["wv"], p["bq"], p["bk"], p["bv"]]
    if has_mask:
        in_specs.append(pl.BlockSpec((S, S), lambda b, h: (0, 0)))
        args.append(mask)
    return pl.pallas_call(
        kernel,
        out_shape=jax.ShapeDtypeStruct((B, H, S, dh), ACT_DTYPE),
        grid=(B, H),
        in_specs=in_specs,
        out_specs=pl.BlockSpec((1, 1, S, dh), lambda b, h: (b, h, 0, 0)),
        compiler_params=pltpu.CompilerParams(
            dimension_semantics=("parallel", "parallel")),
    )(*args)


def fused_cross_attention(x, mem, p, nhead):
    # x: (B, Sq, D) bf16 (queries), mem: (B, Sk, D) bf16 (keys/values source).
    B, Sq, D = x.shape
    Sk = mem.shape[1]
    H = nhead
    dh = D // H
    scale = 1.0 / math.sqrt(dh)
    kernel = functools.partial(_cross_attn_kernel, scale=scale)
    return pl.pallas_call(
        kernel,
        out_shape=jax.ShapeDtypeStruct((B, H, Sq, dh), ACT_DTYPE),
        grid=(B, H),
        in_specs=[
            pl.BlockSpec((1, Sq, D), lambda b, h: (b, 0, 0)),
            pl.BlockSpec((1, Sk, D), lambda b, h: (b, 0, 0)),
            pl.BlockSpec((1, D, dh), lambda b, h: (h, 0, 0)),
            pl.BlockSpec((1, D, dh), lambda b, h: (h, 0, 0)),
            pl.BlockSpec((1, D, dh), lambda b, h: (h, 0, 0)),
            pl.BlockSpec((1, 1, dh), lambda b, h: (h, 0, 0)),
            pl.BlockSpec((1, 1, dh), lambda b, h: (h, 0, 0)),
            pl.BlockSpec((1, 1, dh), lambda b, h: (h, 0, 0)),
        ],
        out_specs=pl.BlockSpec((1, 1, Sq, dh), lambda b, h: (b, h, 0, 0)),
        compiler_params=pltpu.CompilerParams(
            dimension_semantics=("parallel", "parallel")),
    )(x, mem, p["wq"], p["wk"], p["wv"], p["bq"], p["bk"], p["bv"])


# -------------------- attention epilogue: out-proj + residual + LN ----------

def _attn_out_ln_kernel(a_ref, x_ref, wo_ref, bo_ref, g_ref, b_ref, o_ref):
    # a: (1, H, S, dh) bf16 per-head attn outputs; x: (1, S, D) bf16 residual.
    H = a_ref.shape[1]
    acc = None
    for h in range(H):                 # static unrolled head loop; f32 accumulation
        part = jnp.dot(a_ref[0, h], wo_ref[h], preferred_element_type=jnp.float32)
        acc = part if acc is None else acc + part
    y = x_ref[0].astype(jnp.float32) + acc + bo_ref[...]
    o_ref[0] = _ln(y, g_ref[...], b_ref[...]).astype(o_ref.dtype)


def attn_out_ln(a, x, wo, bo, g, b):
    # LayerNorm(x + concat_heads(a) @ Wo + bo), per-batch grid.
    B, H, S, dh = a.shape
    D = x.shape[2]
    return pl.pallas_call(
        _attn_out_ln_kernel,
        out_shape=jax.ShapeDtypeStruct((B, S, D), ACT_DTYPE),
        grid=(B,),
        in_specs=[
            pl.BlockSpec((1, H, S, dh), lambda i: (i, 0, 0, 0)),
            pl.BlockSpec((1, S, D), lambda i: (i, 0, 0)),
            pl.BlockSpec((H, dh, D), lambda i: (0, 0, 0)),
            pl.BlockSpec((1, D), lambda i: (0, 0)),
            pl.BlockSpec((1, D), lambda i: (0, 0)),
            pl.BlockSpec((1, D), lambda i: (0, 0)),
        ],
        out_specs=pl.BlockSpec((1, S, D), lambda i: (i, 0, 0)),
        compiler_params=pltpu.CompilerParams(dimension_semantics=("parallel",)),
    )(a, x, wo, bo, g, b)


# ---------------------- fused FFN + residual + LayerNorm --------------------

def _ffn_ln_kernel(x_ref, w1_ref, b1_ref, w2_ref, b2_ref, g_ref, b_ref, o_ref):
    x = x_ref[...]                                                   # (tm, D) bf16
    h = jnp.dot(x, w1_ref[...], preferred_element_type=jnp.float32) + b1_ref[...]
    h = jnp.maximum(h, 0.0)                      # (tm, F) intermediate never leaves VMEM
    f = jnp.dot(h.astype(ACT_DTYPE), w2_ref[...],
                preferred_element_type=jnp.float32) + b2_ref[...]
    y = x.astype(jnp.float32) + f
    o_ref[...] = _ln(y, g_ref[...], b_ref[...]).astype(o_ref.dtype)


def ffn_ln(x, w1, b1, w2, b2, g, b):
    # x: (M, D) bf16 -> LayerNorm(x + relu(x@w1+b1)@w2 + b2) in bf16
    M, D = x.shape
    F = w1.shape[1]
    tm = _row_tile(M)
    return pl.pallas_call(
        _ffn_ln_kernel,
        out_shape=jax.ShapeDtypeStruct((M, D), ACT_DTYPE),
        grid=(pl.cdiv(M, tm),),
        in_specs=[
            pl.BlockSpec((tm, D), lambda i: (i, 0)),
            pl.BlockSpec((D, F), lambda i: (0, 0)),
            pl.BlockSpec((1, F), lambda i: (0, 0)),
            pl.BlockSpec((F, D), lambda i: (0, 0)),
            pl.BlockSpec((1, D), lambda i: (0, 0)),
            pl.BlockSpec((1, D), lambda i: (0, 0)),
            pl.BlockSpec((1, D), lambda i: (0, 0)),
        ],
        out_specs=pl.BlockSpec((tm, D), lambda i: (i, 0)),
        compiler_params=pltpu.CompilerParams(dimension_semantics=("parallel",)),
    )(x, w1, b1, w2, b2, g, b)


# --------------------------- model building blocks --------------------------

def self_attn_block(x3, p, mask, nhead, ln_g, ln_b):
    a = fused_self_attention(x3, p, mask, nhead)
    return attn_out_ln(a, x3, p["wo"], p["bo"], ln_g, ln_b)


def cross_attn_block(x3, mem3, p, nhead, ln_g, ln_b):
    a = fused_cross_attention(x3, mem3, p, nhead)
    return attn_out_ln(a, x3, p["wo"], p["bo"], ln_g, ln_b)


def transformer_forward(params, src, src_mask, *, nhead):
    S, B = src.shape
    D = params["tok_emb"].shape[1]

    # Embedding (plain-JAX gather glue): enc(src)*sqrt(D) + pos(positions), (B, S, D) bf16.
    tok = jnp.take(params["tok_emb"], src.T, axis=0)                  # (B, S, D) f32
    pos = params["pos_emb"][:S][None, :, :]                           # (1, S, D) f32
    x3 = (tok * math.sqrt(D) + pos).astype(ACT_DTYPE)                 # (B, S, D) bf16

    # ----- TransformerEncoder (post-norm layers + final norm) -----
    h3 = x3
    for lp in params["enc_layers"]:
        h3 = self_attn_block(h3, lp["self_attn"], src_mask, nhead, lp["ln1_g"], lp["ln1_b"])
        h2 = ffn_ln(h3.reshape(B * S, D), lp["w1"], lp["b1"], lp["w2"], lp["b2"],
                    lp["ln2_g"], lp["ln2_b"])
        h3 = h2.reshape(B, S, D)
    memory = layernorm(h3.reshape(B * S, D),
                       params["enc_norm_g"], params["enc_norm_b"]).reshape(B, S, D)

    # ----- TransformerDecoder (tgt = src embedding; no tgt/memory masks, matching
    #        nn.Transformer(src, src, src_mask)) -----
    t3 = x3
    for lp in params["dec_layers"]:
        t3 = self_attn_block(t3, lp["self_attn"], None, nhead, lp["ln1_g"], lp["ln1_b"])
        t3 = cross_attn_block(t3, memory, lp["cross_attn"], nhead, lp["ln2_g"], lp["ln2_b"])
        t2 = ffn_ln(t3.reshape(B * S, D), lp["w1"], lp["b1"], lp["w2"], lp["b2"],
                    lp["ln3_g"], lp["ln3_b"])
        t3 = t2.reshape(B, S, D)
    out2d = layernorm(t3.reshape(B * S, D), params["dec_norm_g"], params["dec_norm_b"])

    # Final vocab projection (weight-read-once ordering), then restore (S, B, V) layout.
    V = params["out_w"].shape[1]
    logits = linear(out2d, params["out_w"], params["out_b"], out_dtype=jnp.float32)
    return logits.reshape(B, S, V).transpose(1, 0, 2)                 # (S, B, V)


# ------------------------------ parameter init ------------------------------

def init_params(key, vocab_size, d_model, nhead, num_layers, dim_ff, max_seq):
    dh = d_model // nhead
    state = {"key": key}

    def nxt():
        state["key"], sub = jax.random.split(state["key"])
        return sub

    def u(shape, scale=0.1, dtype=jnp.float32):
        return jax.random.uniform(nxt(), shape, jnp.float32, -scale, scale).astype(dtype)

    def wb(shape):                 # matmul weights: pre-cast to bf16 once at init
        return u(shape, dtype=ACT_DTYPE)

    def zeros(shape):
        return jnp.zeros(shape, jnp.float32)

    def ones(shape):
        return jnp.ones(shape, jnp.float32)

    def mha_params():
        # per-head weight layout: (H, D, dh) for q/k/v, (H, dh, D) for the out-proj
        return dict(
            wq=wb((nhead, d_model, dh)), wk=wb((nhead, d_model, dh)), wv=wb((nhead, d_model, dh)),
            bq=zeros((nhead, 1, dh)), bk=zeros((nhead, 1, dh)), bv=zeros((nhead, 1, dh)),
            wo=wb((nhead, dh, d_model)), bo=zeros((1, d_model)),
        )

    def ffn_params():
        return dict(w1=wb((d_model, dim_ff)), b1=zeros((1, dim_ff)),
                    w2=wb((dim_ff, d_model)), b2=zeros((1, d_model)))

    enc_layers = []
    for _ in range(num_layers):
        lp = dict(self_attn=mha_params())
        lp.update(ffn_params())
        lp.update(ln1_g=ones((1, d_model)), ln1_b=zeros((1, d_model)),
                  ln2_g=ones((1, d_model)), ln2_b=zeros((1, d_model)))
        enc_layers.append(lp)

    dec_layers = []
    for _ in range(num_layers):
        lp = dict(self_attn=mha_params(), cross_attn=mha_params())
        lp.update(ffn_params())
        lp.update(ln1_g=ones((1, d_model)), ln1_b=zeros((1, d_model)),
                  ln2_g=ones((1, d_model)), ln2_b=zeros((1, d_model)),
                  ln3_g=ones((1, d_model)), ln3_b=zeros((1, d_model)))
        dec_layers.append(lp)

    return dict(
        tok_emb=u((vocab_size, d_model)),                   # encoder.weight ~ U(-0.1, 0.1)
        pos_emb=jax.random.normal(nxt(), (max_seq, d_model), jnp.float32),
        enc_layers=enc_layers,
        dec_layers=dec_layers,
        enc_norm_g=ones((1, d_model)), enc_norm_b=zeros((1, d_model)),
        dec_norm_g=ones((1, d_model)), dec_norm_b=zeros((1, d_model)),
        out_w=wb((d_model, vocab_size)),                    # decoder.weight ~ U(-0.1, 0.1), bf16
        out_b=zeros((1, vocab_size)),                       # decoder.bias = 0
    )


# ----------------------------------- main -----------------------------------

if __name__ == "__main__":
    vocab_size = 16
    d_model = 32
    nhead = 4
    num_layers = 2
    dim_ff = 64
    max_seq = 64
    S, B = 8, 2

    root = jax.random.PRNGKey(0)
    pkey, dkey = jax.random.split(root)

    params = init_params(pkey, vocab_size, d_model, nhead, num_layers, dim_ff, max_seq)
    src = jax.random.randint(dkey, (S, B), 0, vocab_size, dtype=jnp.int32)
    # generate_square_subsequent_mask(S): -inf above the diagonal, 0 elsewhere
    src_mask = jnp.where(jnp.triu(jnp.ones((S, S), dtype=bool), k=1),
                         jnp.float32(-jnp.inf), jnp.float32(0.0))

    fwd = jax.jit(functools.partial(transformer_forward, nhead=nhead))
    logits = fwd(params, src, src_mask)
    jax.block_until_ready(logits)

    assert logits.shape == (S, B, vocab_size), logits.shape
    assert bool(jnp.all(jnp.isfinite(logits)))
    print("KERNEL_OK")
</pallas_src>

<mosaic_0001>
module attributes {stable_mosaic.version = 11 : i64} {
  func.func @_attn_out_ln_kernel(%arg0: i32, %arg1: memref<1x4x8x8xbf16, #tpu.memory_space<vmem>>, %arg2: memref<1x8x32xbf16, #tpu.memory_space<vmem>>, %arg3: memref<4x8x32xbf16, #tpu.memory_space<vmem>>, %arg4: memref<1x32xf32, #tpu.memory_space<vmem>>, %arg5: memref<1x32xf32, #tpu.memory_space<vmem>>, %arg6: memref<1x32xf32, #tpu.memory_space<vmem>>, %arg7: memref<1x8x32xbf16, #tpu.memory_space<vmem>>) attributes {dimension_semantics = [#tpu.dimension_semantics<parallel>], iteration_bounds = array<i64: 2>, scalar_prefetch = 0 : i64, scratch_operands = 0 : i64, tpu.core_type = #tpu.core_type<tc>, window_params = [{transform_indices = @transform_0, window_bounds = array<i64: 1, 4, 8, 8>}, {transform_indices = @transform_1, window_bounds = array<i64: 1, 8, 32>}, {pipeline_mode = #tpu.pipeline_mode<synchronous>, transform_indices = @transform_2, window_bounds = array<i64: 4, 8, 32>}, {pipeline_mode = #tpu.pipeline_mode<synchronous>, transform_indices = @transform_3, window_bounds = array<i64: 1, 32>}, {pipeline_mode = #tpu.pipeline_mode<synchronous>, transform_indices = @transform_4, window_bounds = array<i64: 1, 32>}, {pipeline_mode = #tpu.pipeline_mode<synchronous>, transform_indices = @transform_5, window_bounds = array<i64: 1, 32>}, {transform_indices = @transform_6, window_bounds = array<i64: 1, 8, 32>}]} {
    %c0 = arith.constant 0 : index
    %c0_0 = arith.constant 0 : index
    %c0_1 = arith.constant 0 : index
    %c0_2 = arith.constant 0 : index
    %0 = vector.load %arg1[%c0, %c0_0, %c0_1, %c0_2] : memref<1x4x8x8xbf16, #tpu.memory_space<vmem>>, vector<1x1x8x8xbf16>
    %1 = vector.shape_cast %0 : vector<1x1x8x8xbf16> to vector<8x8xbf16>
    %c0_3 = arith.constant 0 : index
    %c0_4 = arith.constant 0 : index
    %c0_5 = arith.constant 0 : index
    %2 = vector.load %arg3[%c0_3, %c0_4, %c0_5] : memref<4x8x32xbf16, #tpu.memory_space<vmem>>, vector<1x8x32xbf16>
    %3 = vector.shape_cast %2 : vector<1x8x32xbf16> to vector<8x32xbf16>
    %cst = arith.constant dense<0.000000e+00> : vector<8x32xf32>
    %4 = tpu.matmul %1, %3, %cst {dimension_numbers = #tpu.dot_dimension_numbers<[1], [0], [0], [1], [0, 0, 1, 1], [], []>} : vector<8x8xbf16>, vector<8x32xbf16>, vector<8x32xf32> -> vector<8x32xf32>
    %c0_6 = arith.constant 0 : index
    %c1 = arith.constant 1 : index
    %c0_7 = arith.constant 0 : index
    %c0_8 = arith.constant 0 : index
    %5 = vector.load %arg1[%c0_6, %c1, %c0_7, %c0_8] : memref<1x4x8x8xbf16, #tpu.memory_space<vmem>>, vector<1x1x8x8xbf16>
    %6 = vector.shape_cast %5 : vector<1x1x8x8xbf16> to vector<8x8xbf16>
    %c1_9 = arith.constant 1 : index
    %c0_10 = arith.constant 0 : index
    %c0_11 = arith.constant 0 : index
    %7 = vector.load %arg3[%c1_9, %c0_10, %c0_11] : memref<4x8x32xbf16, #tpu.memory_space<vmem>>, vector<1x8x32xbf16>
    %8 = vector.shape_cast %7 : vector<1x8x32xbf16> to vector<8x32xbf16>
    %cst_12 = arith.constant dense<0.000000e+00> : vector<8x32xf32>
    %9 = tpu.matmul %6, %8, %cst_12 {dimension_numbers = #tpu.dot_dimension_numbers<[1], [0], [0], [1], [0, 0, 1, 1], [], []>} : vector<8x8xbf16>, vector<8x32xbf16>, vector<8x32xf32> -> vector<8x32xf32>
    %10 = arith.addf %4, %9 : vector<8x32xf32>
    %c0_13 = arith.constant 0 : index
    %c2 = arith.constant 2 : index
    %c0_14 = arith.constant 0 : index
    %c0_15 = arith.constant 0 : index
    %11 = vector.load %arg1[%c0_13, %c2, %c0_14, %c0_15] : memref<1x4x8x8xbf16, #tpu.memory_space<vmem>>, vector<1x1x8x8xbf16>
    %12 = vector.shape_cast %11 : vector<1x1x8x8xbf16> to vector<8x8xbf16>
    %c2_16 = arith.constant 2 : index
    %c0_17 = arith.constant 0 : index
    %c0_18 = arith.constant 0 : index
    %13 = vector.load %arg3[%c2_16, %c0_17, %c0_18] : memref<4x8x32xbf16, #tpu.memory_space<vmem>>, vector<1x8x32xbf16>
    %14 = vector.shape_cast %13 : vector<1x8x32xbf16> to vector<8x32xbf16>
    %cst_19 = arith.constant dense<0.000000e+00> : vector<8x32xf32>
    %15 = tpu.matmul %12, %14, %cst_19 {dimension_numbers = #tpu.dot_dimension_numbers<[1], [0], [0], [1], [0, 0, 1, 1], [], []>} : vector<8x8xbf16>, vector<8x32xbf16>, vector<8x32xf32> -> vector<8x32xf32>
    %16 = arith.addf %10, %15 : vector<8x32xf32>
    %c0_20 = arith.constant 0 : index
    %c3 = arith.constant 3 : index
    %c0_21 = arith.constant 0 : index
    %c0_22 = arith.constant 0 : index
    %17 = vector.load %arg1[%c0_20, %c3, %c0_21, %c0_22] : memref<1x4x8x8xbf16, #tpu.memory_space<vmem>>, vector<1x1x8x8xbf16>
    %18 = vector.shape_cast %17 : vector<1x1x8x8xbf16> to vector<8x8xbf16>
    %c3_23 = arith.constant 3 : index
    %c0_24 = arith.constant 0 : index
    %c0_25 = arith.constant 0 : index
    %19 = vector.load %arg3[%c3_23, %c0_24, %c0_25] : memref<4x8x32xbf16, #tpu.memory_space<vmem>>, vector<1x8x32xbf16>
    %20 = vector.shape_cast %19 : vector<1x8x32xbf16> to vector<8x32xbf16>
    %cst_26 = arith.constant dense<0.000000e+00> : vector<8x32xf32>
    %21 = tpu.matmul %18, %20, %cst_26 {dimension_numbers = #tpu.dot_dimension_numbers<[1], [0], [0], [1], [0, 0, 1, 1], [], []>} : vector<8x8xbf16>, vector<8x32xbf16>, vector<8x32xf32> -> vector<8x32xf32>
    %22 = arith.addf %16, %21 : vector<8x32xf32>
    %c0_27 = arith.constant 0 : index
    %c0_28 = arith.constant 0 : index
    %c0_29 = arith.constant 0 : index
    %23 = vector.load %arg2[%c0_27, %c0_28, %c0_29] : memref<1x8x32xbf16, #tpu.memory_space<vmem>>, vector<1x8x32xbf16>
    %24 = vector.shape_cast %23 : vector<1x8x32xbf16> to vector<8x32xbf16>
    %25 = arith.extf %24 : vector<8x32xbf16> to vector<8x32xf32>
    %26 = arith.addf %25, %22 : vector<8x32xf32>
    %c0_30 = arith.constant 0 : index
    %c0_31 = arith.constant 0 : index
    %27 = vector.load %arg4[%c0_30, %c0_31] : memref<1x32xf32, #tpu.memory_space<vmem>>, vector<1x32xf32>
    %28 = vector.broadcast %27 : vector<1x32xf32> to vector<8x32xf32>
    %29 = arith.addf %26, %28 : vector<8x32xf32>
    %c0_32 = arith.constant 0 : index
    %c0_33 = arith.constant 0 : index
    %30 = vector.load %arg5[%c0_32, %c0_33] : memref<1x32xf32, #tpu.memory_space<vmem>>, vector<1x32xf32>
    %c0_34 = arith.constant 0 : index
    %c0_35 = arith.constant 0 : index
    %31 = vector.load %arg6[%c0_34, %c0_35] : memref<1x32xf32, #tpu.memory_space<vmem>>, vector<1x32xf32>
    %cst_36 = arith.constant dense<0.000000e+00> : vector<8xf32>
    %32 = vector.multi_reduction <add>, %29, %cst_36 [1] : vector<8x32xf32> to vector<8xf32>
    %33 = vector.shape_cast %32 : vector<8xf32> to vector<8x1xf32>
    %cst_37 = arith.constant 3.200000e+01 : f32
    %34 = vector.broadcast %cst_37 : f32 to vector<8x1xf32>
    %35 = arith.divf %33, %34 : vector<8x1xf32>
    %36 = vector.broadcast %35 : vector<8x1xf32> to vector<8x32xf32>
    %37 = arith.subf %29, %36 : vector<8x32xf32>
    %38 = arith.mulf %37, %37 : vector<8x32xf32>
    %cst_38 = arith.constant dense<0.000000e+00> : vector<8xf32>
    %39 = vector.multi_reduction <add>, %38, %cst_38 [1] : vector<8x32xf32> to vector<8xf32>
    %40 = vector.shape_cast %39 : vector<8xf32> to vector<8x1xf32>
    %cst_39 = arith.constant 3.200000e+01 : f32
    %41 = vector.broadcast %cst_39 : f32 to vector<8x1xf32>
    %42 = arith.divf %40, %41 : vector<8x1xf32>
    %cst_40 = arith.constant 9.99999974E-6 : f32
    %43 = vector.broadcast %cst_40 : f32 to vector<8x1xf32>
    %44 = arith.addf %42, %43 : vector<8x1xf32>
    %45 = math.rsqrt %44 : vector<8x1xf32>
    %46 = vector.broadcast %45 : vector<8x1xf32> to vector<8x32xf32>
    %47 = arith.mulf %37, %46 : vector<8x32xf32>
    %48 = vector.broadcast %30 : vector<1x32xf32> to vector<8x32xf32>
    %49 = arith.mulf %47, %48 : vector<8x32xf32>
    %50 = vector.broadcast %31 : vector<1x32xf32> to vector<8x32xf32>
    %51 = arith.addf %49, %50 : vector<8x32xf32>
    %52 = arith.truncf %51 : vector<8x32xf32> to vector<8x32xbf16>
    %c0_41 = arith.constant 0 : index
    %c0_42 = arith.constant 0 : index
    %c0_43 = arith.constant 0 : index
    %53 = vector.load %arg7[%c0_41, %c0_42, %c0_43] : memref<1x8x32xbf16, #tpu.memory_space<vmem>>, vector<1x8x32xbf16>
    %54 = vector.shape_cast %53 : vector<1x8x32xbf16> to vector<8x32xbf16>
    %55 = vector.shape_cast %52 : vector<8x32xbf16> to vector<1x8x32xbf16>
    tpu.vector_store %arg7[%c0_41, %c0_42, %c0_43], %55 {strides = array<i32>} : memref<1x8x32xbf16, #tpu.memory_space<vmem>>, vector<1x8x32xbf16>,
    return
  }
  func.func @transform_0(%arg0: i32) -> (i32, i32, i32, i32) {
    %c0_i32 = arith.constant 0 : i32
    %c0_i32_0 = arith.constant 0 : i32
    %c0_i32_1 = arith.constant 0 : i32
    %c0_i32_2 = arith.constant 0 : i32
    return %arg0, %c0_i32, %c0_i32_0, %c0_i32_1 : i32, i32, i32, i32
  }
  func.func @transform_1(%arg0: i32) -> (i32, i32, i32) {
    %c0_i32 = arith.constant 0 : i32
    %c0_i32_0 = arith.constant 0 : i32
    %c0_i32_1 = arith.constant 0 : i32
    return %arg0, %c0_i32, %c0_i32_0 : i32, i32, i32
  }
  func.func @transform_2(%arg0: i32) -> (i32, i32, i32) {
    %c0_i32 = arith.constant 0 : i32
    %c0_i32_0 = arith.constant 0 : i32
    %c0_i32_1 = arith.constant 0 : i32
    %c0_i32_2 = arith.constant 0 : i32
    return %c0_i32, %c0_i32_0, %c0_i32_1 : i32, i32, i32
  }
  func.func @transform_3(%arg0: i32) -> (i32, i32) {
    %c0_i32 = arith.constant 0 : i32
    %c0_i32_0 = arith.constant 0 : i32
    %c0_i32_1 = arith.constant 0 : i32
    return %c0_i32, %c0_i32_0 : i32, i32
  }
  func.func @transform_4(%arg0: i32) -> (i32, i32) {
    %c0_i32 = arith.constant 0 : i32
    %c0_i32_0 = arith.constant 0 : i32
    %c0_i32_1 = arith.constant 0 : i32
    return %c0_i32, %c0_i32_0 : i32, i32
  }
  func.func @transform_5(%arg0: i32) -> (i32, i32) {
    %c0_i32 = arith.constant 0 : i32
    %c0_i32_0 = arith.constant 0 : i32
    %c0_i32_1 = arith.constant 0 : i32
    return %c0_i32, %c0_i32_0 : i32, i32
  }
  func.func @transform_6(%arg0: i32) -> (i32, i32, i32) {
    %c0_i32 = arith.constant 0 : i32
    %c0_i32_0 = arith.constant 0 : i32
    %c0_i32_1 = arith.constant 0 : i32
    return %arg0, %c0_i32, %c0_i32_0 : i32, i32, i32
  }
}

module attributes {stable_mosaic.version = 11 : i64} {
  func.func @_self_attn_kernel(%arg0: i32, %arg1: i32, %arg2: memref<1x8x32xbf16, #tpu.memory_space<vmem>>, %arg3: memref<1x32x8xbf16, #tpu.memory_space<vmem>>, %arg4: memref<1x32x8xbf16, #tpu.memory_space<vmem>>, %arg5: memref<1x32x8xbf16, #tpu.memory_space<vmem>>, %arg6: memref<1x1x8xf32, #tpu.memory_space<vmem>>, %arg7: memref<1x1x8xf32, #tpu.memory_space<vmem>>, %arg8: memref<1x1x8xf32, #tpu.memory_space<vmem>>, %arg9: memref<8x8xf32, #tpu.memory_space<vmem>>, %arg10: memref<1x1x8x8xbf16, #tpu.memory_space<vmem>>) attributes {dimension_semantics = [#tpu.dimension_semantics<parallel>, #tpu.dimension_semantics<parallel>], iteration_bounds = array<i64: 2, 4>, scalar_prefetch = 0 : i64, scratch_operands = 0 : i64, tpu.core_type = #tpu.core_type<tc>, window_params = [{transform_indices = @transform_0, window_bounds = array<i64: 1, 8, 32>}, {transform_indices = @transform_1, window_bounds = array<i64: 1, 32, 8>}, {transform_indices = @transform_2, window_bounds = array<i64: 1, 32, 8>}, {transform_indices = @transform_3, window_bounds = array<i64: 1, 32, 8>}, {transform_indices = @transform_4, window_bounds = array<i64: 1, 1, 8>}, {transform_indices = @transform_5, window_bounds = array<i64: 1, 1, 8>}, {transform_indices = @transform_6, window_bounds = array<i64: 1, 1, 8>}, {pipeline_mode = #tpu.pipeline_mode<synchronous>, transform_indices = @transform_7, window_bounds = array<i64: 8, 8>}, {transform_indices = @transform_8, window_bounds = array<i64: 1, 1, 8, 8>}]} {
    %c0 = arith.constant 0 : index
    %c0_0 = arith.constant 0 : index
    %0 = vector.load %arg9[%c0, %c0_0] : memref<8x8xf32, #tpu.memory_space<vmem>>, vector<8x8xf32>
    %c0_1 = arith.constant 0 : index
    %c0_2 = arith.constant 0 : index
    %c0_3 = arith.constant 0 : index
    %1 = vector.load %arg2[%c0_1, %c0_2, %c0_3] : memref<1x8x32xbf16, #tpu.memory_space<vmem>>, vector<1x8x32xbf16>
    %2 = vector.shape_cast %1 : vector<1x8x32xbf16> to vector<8x32xbf16>
    %c0_4 = arith.constant 0 : index
    %c0_5 = arith.constant 0 : index
    %c0_6 = arith.constant 0 : index
    %3 = vector.load %arg3[%c0_4, %c0_5, %c0_6] : memref<1x32x8xbf16, #tpu.memory_space<vmem>>, vector<1x32x8xbf16>
    %4 = vector.shape_cast %3 : vector<1x32x8xbf16> to vector<32x8xbf16>
    %cst = arith.constant dense<0.000000e+00> : vector<8x8xf32>
    %5 = tpu.matmul %2, %4, %cst {dimension_numbers = #tpu.dot_dimension_numbers<[1], [0], [0], [1], [0, 0, 1, 1], [], []>} : vector<8x32xbf16>, vector<32x8xbf16>, vector<8x8xf32> -> vector<8x8xf32>
    %c0_7 = arith.constant 0 : index
    %c0_8 = arith.constant 0 : index
    %c0_9 = arith.constant 0 : index
    %6 = vector.load %arg6[%c0_7, %c0_8, %c0_9] : memref<1x1x8xf32, #tpu.memory_space<vmem>>, vector<1x1x8xf32>
    %7 = vector.shape_cast %6 : vector<1x1x8xf32> to vector<1x8xf32>
    %8 = vector.broadcast %7 : vector<1x8xf32> to vector<8x8xf32>
    %9 = arith.addf %5, %8 : vector<8x8xf32>
    %c0_10 = arith.constant 0 : index
    %c0_11 = arith.constant 0 : index
    %c0_12 = arith.constant 0 : index
    %10 = vector.load %arg4[%c0_10, %c0_11, %c0_12] : memref<1x32x8xbf16, #tpu.memory_space<vmem>>, vector<1x32x8xbf16>
    %11 = vector.shape_cast %10 : vector<1x32x8xbf16> to vector<32x8xbf16>
    %cst_13 = arith.constant dense<0.000000e+00> : vector<8x8xf32>
    %12 = tpu.matmul %2, %11, %cst_13 {dimension_numbers = #tpu.dot_dimension_numbers<[1], [0], [0], [1], [0, 0, 1, 1], [], []>} : vector<8x32xbf16>, vector<32x8xbf16>, vector<8x8xf32> -> vector<8x8xf32>
    %c0_14 = arith.constant 0 : index
    %c0_15 = arith.constant 0 : index
    %c0_16 = arith.constant 0 : index
    %13 = vector.load %arg7[%c0_14, %c0_15, %c0_16] : memref<1x1x8xf32, #tpu.memory_space<vmem>>, vector<1x1x8xf32>
    %14 = vector.shape_cast %13 : vector<1x1x8xf32> to vector<1x8xf32>
    %15 = vector.broadcast %14 : vector<1x8xf32> to vector<8x8xf32>
    %16 = arith.addf %12, %15 : vector<8x8xf32>
    %c0_17 = arith.constant 0 : index
    %c0_18 = arith.constant 0 : index
    %c0_19 = arith.constant 0 : index
    %17 = vector.load %arg5[%c0_17, %c0_18, %c0_19] : memref<1x32x8xbf16, #tpu.memory_space<vmem>>, vector<1x32x8xbf16>
    %18 = vector.shape_cast %17 : vector<1x32x8xbf16> to vector<32x8xbf16>
    %cst_20 = arith.constant dense<0.000000e+00> : vector<8x8xf32>
    %19 = tpu.matmul %2, %18, %cst_20 {dimension_numbers = #tpu.dot_dimension_numbers<[1], [0], [0], [1], [0, 0, 1, 1], [], []>} : vector<8x32xbf16>, vector<32x8xbf16>, vector<8x8xf32> -> vector<8x8xf32>
    %c0_21 = arith.constant 0 : index
    %c0_22 = arith.constant 0 : index
    %c0_23 = arith.constant 0 : index
    %20 = vector.load %arg8[%c0_21, %c0_22, %c0_23] : memref<1x1x8xf32, #tpu.memory_space<vmem>>, vector<1x1x8xf32>
    %21 = vector.shape_cast %20 : vector<1x1x8xf32> to vector<1x8xf32>
    %22 = vector.broadcast %21 : vector<1x8xf32> to vector<8x8xf32>
    %23 = arith.addf %19, %22 : vector<8x8xf32>
    %24 = arith.truncf %9 : vector<8x8xf32> to vector<8x8xbf16>
    %25 = arith.truncf %16 : vector<8x8xf32> to vector<8x8xbf16>
    "tpu.trace_start"() <{level = 10 : i32, message = "qd,kd->qk"}> : () -> ()
    %cst_24 = arith.constant dense<0.000000e+00> : vector<8x8xf32>
    %26 = tpu.matmul %24, %25, %cst_24 {dimension_numbers = #tpu.dot_dimension_numbers<[1], [1], [0], [0], [0, 0, 1, 0], [], []>} : vector<8x8xbf16>, vector<8x8xbf16>, vector<8x8xf32> -> vector<8x8xf32>
    "tpu.trace_stop"() : () -> ()
    %cst_25 = arith.constant 0.353553385 : f32
    %27 = vector.broadcast %cst_25 : f32 to vector<8x8xf32>
    %28 = arith.mulf %26, %27 : vector<8x8xf32>
    %29 = arith.addf %28, %0 : vector<8x8xf32>
    %cst_26 = arith.constant dense<0xFF800000> : vector<8xf32>
    %30 = vector.multi_reduction <maximumf>, %29, %cst_26 [1] : vector<8x8xf32> to vector<8xf32>
    %31 = vector.shape_cast %30 : vector<8xf32> to vector<8x1xf32>
    %32 = vector.broadcast %31 : vector<8x1xf32> to vector<8x8xf32>
    %33 = arith.subf %29, %32 : vector<8x8xf32>
    %34 = math.exp %33 : vector<8x8xf32>
    %cst_27 = arith.constant dense<0.000000e+00> : vector<8xf32>
    %35 = vector.multi_reduction <add>, %34, %cst_27 [1] : vector<8x8xf32> to vector<8xf32>
    %36 = vector.shape_cast %35 : vector<8xf32> to vector<8x1xf32>
    %37 = tpu.reciprocal %36 {approx = true} : vector<8x1xf32> -> vector<8x1xf32>
    %38 = vector.broadcast %37 : vector<8x1xf32> to vector<8x8xf32>
    %39 = arith.mulf %34, %38 : vector<8x8xf32>
    %40 = arith.truncf %39 : vector<8x8xf32> to vector<8x8xbf16>
    %41 = arith.truncf %23 : vector<8x8xf32> to vector<8x8xbf16>
    %cst_28 = arith.constant dense<0.000000e+00> : vector<8x8xf32>
    %42 = tpu.matmul %40, %41, %cst_28 {dimension_numbers = #tpu.dot_dimension_numbers<[1], [0], [0], [1], [0, 0, 1, 1], [], []>} : vector<8x8xbf16>, vector<8x8xbf16>, vector<8x8xf32> -> vector<8x8xf32>
    %43 = arith.truncf %42 : vector<8x8xf32> to vector<8x8xbf16>
    %c0_29 = arith.constant 0 : index
    %c0_30 = arith.constant 0 : index
    %c0_31 = arith.constant 0 : index
    %c0_32 = arith.constant 0 : index
    %44 = vector.load %arg10[%c0_29, %c0_30, %c0_31, %c0_32] : memref<1x1x8x8xbf16, #tpu.memory_space<vmem>>, vector<1x1x8x8xbf16>
    %45 = vector.shape_cast %44 : vector<1x1x8x8xbf16> to vector<8x8xbf16>
    %46 = vector.shape_cast %43 : vector<8x8xbf16> to vector<1x1x8x8xbf16>
    tpu.vector_store %arg10[%c0_29, %c0_30, %c0_31, %c0_32], %46 {strides = array<i32>} : memref<1x1x8x8xbf16, #tpu.memory_space<vmem>>, vector<1x1x8x8xbf16>,
    return
  }
  func.func @transform_0(%arg0: i32, %arg1: i32) -> (i32, i32, i32) {
    %c0_i32 = arith.constant 0 : i32
    %c0_i32_0 = arith.constant 0 : i32
    %c0_i32_1 = arith.constant 0 : i32
    return %arg0, %c0_i32, %c0_i32_0 : i32, i32, i32
  }
  func.func @transform_1(%arg0: i32, %arg1: i32) -> (i32, i32, i32) {
    %c0_i32 = arith.constant 0 : i32
    %c0_i32_0 = arith.constant 0 : i32
    %c0_i32_1 = arith.constant 0 : i32
    return %arg1, %c0_i32, %c0_i32_0 : i32, i32, i32
  }
  func.func @transform_2(%arg0: i32, %arg1: i32) -> (i32, i32, i32) {
    %c0_i32 = arith.constant 0 : i32
    %c0_i32_0 = arith.constant 0 : i32
    %c0_i32_1 = arith.constant 0 : i32
    return %arg1, %c0_i32, %c0_i32_0 : i32, i32, i32
  }
  func.func @transform_3(%arg0: i32, %arg1: i32) -> (i32, i32, i32) {
    %c0_i32 = arith.constant 0 : i32
    %c0_i32_0 = arith.constant 0 : i32
    %c0_i32_1 = arith.constant 0 : i32
    return %arg1, %c0_i32, %c0_i32_0 : i32, i32, i32
  }
  func.func @transform_4(%arg0: i32, %arg1: i32) -> (i32, i32, i32) {
    %c0_i32 = arith.constant 0 : i32
    %c0_i32_0 = arith.constant 0 : i32
    %c0_i32_1 = arith.constant 0 : i32
    return %arg1, %c0_i32, %c0_i32_0 : i32, i32, i32
  }
  func.func @transform_5(%arg0: i32, %arg1: i32) -> (i32, i32, i32) {
    %c0_i32 = arith.constant 0 : i32
    %c0_i32_0 = arith.constant 0 : i32
    %c0_i32_1 = arith.constant 0 : i32
    return %arg1, %c0_i32, %c0_i32_0 : i32, i32, i32
  }
  func.func @transform_6(%arg0: i32, %arg1: i32) -> (i32, i32, i32) {
    %c0_i32 = arith.constant 0 : i32
    %c0_i32_0 = arith.constant 0 : i32
    %c0_i32_1 = arith.constant 0 : i32
    return %arg1, %c0_i32, %c0_i32_0 : i32, i32, i32
  }
  func.func @transform_7(%arg0: i32, %arg1: i32) -> (i32, i32) {
    %c0_i32 = arith.constant 0 : i32
    %c0_i32_0 = arith.constant 0 : i32
    %c0_i32_1 = arith.constant 0 : i32
    return %c0_i32, %c0_i32_0 : i32, i32
  }
  func.func @transform_8(%arg0: i32, %arg1: i32) -> (i32, i32, i32, i32) {
    %c0_i32 = arith.constant 0 : i32
    %c0_i32_0 = arith.constant 0 : i32
    %c0_i32_1 = arith.constant 0 : i32
    return %arg0, %arg1, %c0_i32, %c0_i32_0 : i32, i32, i32, i32
  }
}

module attributes {stable_mosaic.version = 11 : i64} {
  func.func @_ffn_ln_kernel(%arg0: i32, %arg1: memref<16x32xbf16, #tpu.memory_space<vmem>>, %arg2: memref<32x64xbf16, #tpu.memory_space<vmem>>, %arg3: memref<1x64xf32, #tpu.memory_space<vmem>>, %arg4: memref<64x32xbf16, #tpu.memory_space<vmem>>, %arg5: memref<1x32xf32, #tpu.memory_space<vmem>>, %arg6: memref<1x32xf32, #tpu.memory_space<vmem>>, %arg7: memref<1x32xf32, #tpu.memory_space<vmem>>, %arg8: memref<16x32xbf16, #tpu.memory_space<vmem>>) attributes {dimension_semantics = [#tpu.dimension_semantics<parallel>], iteration_bounds = array<i64: 1>, scalar_prefetch = 0 : i64, scratch_operands = 0 : i64, tpu.core_type = #tpu.core_type<tc>, window_params = [{transform_indices = @transform_0, window_bounds = array<i64: 16, 32>}, {pipeline_mode = #tpu.pipeline_mode<synchronous>, transform_indices = @transform_1, window_bounds = array<i64: 32, 64>}, {pipeline_mode = #tpu.pipeline_mode<synchronous>, transform_indices = @transform_2, window_bounds = array<i64: 1, 64>}, {pipeline_mode = #tpu.pipeline_mode<synchronous>, transform_indices = @transform_3, window_bounds = array<i64: 64, 32>}, {pipeline_mode = #tpu.pipeline_mode<synchronous>, transform_indices = @transform_4, window_bounds = array<i64: 1, 32>}, {pipeline_mode = #tpu.pipeline_mode<synchronous>, transform_indices = @transform_5, window_bounds = array<i64: 1, 32>}, {pipeline_mode = #tpu.pipeline_mode<synchronous>, transform_indices = @transform_6, window_bounds = array<i64: 1, 32>}, {transform_indices = @transform_7, window_bounds = array<i64: 16, 32>}]} {
    %c0 = arith.constant 0 : index
    %c0_0 = arith.constant 0 : index
    %0 = vector.load %arg1[%c0, %c0_0] : memref<16x32xbf16, #tpu.memory_space<vmem>>, vector<16x32xbf16>
    %c0_1 = arith.constant 0 : index
    %c0_2 = arith.constant 0 : index
    %1 = vector.load %arg2[%c0_1, %c0_2] : memref<32x64xbf16, #tpu.memory_space<vmem>>, vector<32x64xbf16>
    %cst = arith.constant dense<0.000000e+00> : vector<16x64xf32>
    %2 = tpu.matmul %0, %1, %cst {dimension_numbers = #tpu.dot_dimension_numbers<[1], [0], [0], [1], [0, 0, 1, 1], [], []>} : vector<16x32xbf16>, vector<32x64xbf16>, vector<16x64xf32> -> vector<16x64xf32>
    %c0_3 = arith.constant 0 : index
    %c0_4 = arith.constant 0 : index
    %3 = vector.load %arg3[%c0_3, %c0_4] : memref<1x64xf32, #tpu.memory_space<vmem>>, vector<1x64xf32>
    %4 = vector.broadcast %3 : vector<1x64xf32> to vector<16x64xf32>
    %5 = arith.addf %2, %4 : vector<16x64xf32>
    %cst_5 = arith.constant 0.000000e+00 : f32
    %6 = vector.broadcast %cst_5 : f32 to vector<16x64xf32>
    %7 = arith.maximumf %5, %6 : vector<16x64xf32>
    %8 = arith.truncf %7 : vector<16x64xf32> to vector<16x64xbf16>
    %c0_6 = arith.constant 0 : index
    %c0_7 = arith.constant 0 : index
    %9 = vector.load %arg4[%c0_6, %c0_7] : memref<64x32xbf16, #tpu.memory_space<vmem>>, vector<64x32xbf16>
    %cst_8 = arith.constant dense<0.000000e+00> : vector<16x32xf32>
    %10 = tpu.matmul %8, %9, %cst_8 {dimension_numbers = #tpu.dot_dimension_numbers<[1], [0], [0], [1], [0, 0, 1, 1], [], []>} : vector<16x64xbf16>, vector<64x32xbf16>, vector<16x32xf32> -> vector<16x32xf32>
    %c0_9 = arith.constant 0 : index
    %c0_10 = arith.constant 0 : index
    %11 = vector.load %arg5[%c0_9, %c0_10] : memref<1x32xf32, #tpu.memory_space<vmem>>, vector<1x32xf32>
    %12 = vector.broadcast %11 : vector<1x32xf32> to vector<16x32xf32>
    %13 = arith.addf %10, %12 : vector<16x32xf32>
    %14 = arith.extf %0 : vector<16x32xbf16> to vector<16x32xf32>
    %15 = arith.addf %14, %13 : vector<16x32xf32>
    %c0_11 = arith.constant 0 : index
    %c0_12 = arith.constant 0 : index
    %16 = vector.load %arg6[%c0_11, %c0_12] : memref<1x32xf32, #tpu.memory_space<vmem>>, vector<1x32xf32>
    %c0_13 = arith.constant 0 : index
    %c0_14 = arith.constant 0 : index
    %17 = vector.load %arg7[%c0_13, %c0_14] : memref<1x32xf32, #tpu.memory_space<vmem>>, vector<1x32xf32>
    %cst_15 = arith.constant dense<0.000000e+00> : vector<16xf32>
    %18 = vector.multi_reduction <add>, %15, %cst_15 [1] : vector<16x32xf32> to vector<16xf32>
    %19 = vector.shape_cast %18 : vector<16xf32> to vector<16x1xf32>
    %cst_16 = arith.constant 3.200000e+01 : f32
    %20 = vector.broadcast %cst_16 : f32 to vector<16x1xf32>
    %21 = arith.divf %19, %20 : vector<16x1xf32>
    %22 = vector.broadcast %21 : vector<16x1xf32> to vector<16x32xf32>
    %23 = arith.subf %15, %22 : vector<16x32xf32>
    %24 = arith.mulf %23, %23 : vector<16x32xf32>
    %cst_17 = arith.constant dense<0.000000e+00> : vector<16xf32>
    %25 = vector.multi_reduction <add>, %24, %cst_17 [1] : vector<16x32xf32> to vector<16xf32>
    %26 = vector.shape_cast %25 : vector<16xf32> to vector<16x1xf32>
    %cst_18 = arith.constant 3.200000e+01 : f32
    %27 = vector.broadcast %cst_18 : f32 to vector<16x1xf32>
    %28 = arith.divf %26, %27 : vector<16x1xf32>
    %cst_19 = arith.constant 9.99999974E-6 : f32
    %29 = vector.broadcast %cst_19 : f32 to vector<16x1xf32>
    %30 = arith.addf %28, %29 : vector<16x1xf32>
    %31 = math.rsqrt %30 : vector<16x1xf32>
    %32 = vector.broadcast %31 : vector<16x1xf32> to vector<16x32xf32>
    %33 = arith.mulf %23, %32 : vector<16x32xf32>
    %34 = vector.broadcast %16 : vector<1x32xf32> to vector<16x32xf32>
    %35 = arith.mulf %33, %34 : vector<16x32xf32>
    %36 = vector.broadcast %17 : vector<1x32xf32> to vector<16x32xf32>
    %37 = arith.addf %35, %36 : vector<16x32xf32>
    %38 = arith.truncf %37 : vector<16x32xf32> to vector<16x32xbf16>
    %c0_20 = arith.constant 0 : index
    %c0_21 = arith.constant 0 : index
    %39 = vector.load %arg8[%c0_20, %c0_21] : memref<16x32xbf16, #tpu.memory_space<vmem>>, vector<16x32xbf16>
    tpu.vector_store %arg8[%c0_20, %c0_21], %38 {strides = array<i32>} : memref<16x32xbf16, #tpu.memory_space<vmem>>, vector<16x32xbf16>,
    return
  }
  func.func @transform_0(%arg0: i32) -> (i32, i32) {
    %c0_i32 = arith.constant 0 : i32
    %c0_i32_0 = arith.constant 0 : i32
    return %arg0, %c0_i32 : i32, i32
  }
  func.func @transform_1(%arg0: i32) -> (i32, i32) {
    %c0_i32 = arith.constant 0 : i32
    %c0_i32_0 = arith.constant 0 : i32
    %c0_i32_1 = arith.constant 0 : i32
    return %c0_i32, %c0_i32_0 : i32, i32
  }
  func.func @transform_2(%arg0: i32) -> (i32, i32) {
    %c0_i32 = arith.constant 0 : i32
    %c0_i32_0 = arith.constant 0 : i32
    %c0_i32_1 = arith.constant 0 : i32
    return %c0_i32, %c0_i32_0 : i32, i32
  }
  func.func @transform_3(%arg0: i32) -> (i32, i32) {
    %c0_i32 = arith.constant 0 : i32
    %c0_i32_0 = arith.constant 0 : i32
    %c0_i32_1 = arith.constant 0 : i32
    return %c0_i32, %c0_i32_0 : i32, i32
  }
  func.func @transform_4(%arg0: i32) -> (i32, i32) {
    %c0_i32 = arith.constant 0 : i32
    %c0_i32_0 = arith.constant 0 : i32
    %c0_i32_1 = arith.constant 0 : i32
    return %c0_i32, %c0_i32_0 : i32, i32
  }
  func.func @transform_5(%arg0: i32) -> (i32, i32) {
    %c0_i32 = arith.constant 0 : i32
    %c0_i32_0 = arith.constant 0 : i32
    %c0_i32_1 = arith.constant 0 : i32
    return %c0_i32, %c0_i32_0 : i32, i32
  }
  func.func @transform_6(%arg0: i32) -> (i32, i32) {
    %c0_i32 = arith.constant 0 : i32
    %c0_i32_0 = arith.constant 0 : i32
    %c0_i32_1 = arith.constant 0 : i32
    return %c0_i32, %c0_i32_0 : i32, i32
  }
  func.func @transform_7(%arg0: i32) -> (i32, i32) {
    %c0_i32 = arith.constant 0 : i32
    %c0_i32_0 = arith.constant 0 : i32
    return %arg0, %c0_i32 : i32, i32
  }
}

module attributes {stable_mosaic.version = 11 : i64} {
  func.func @_layernorm_kernel(%arg0: i32, %arg1: memref<16x32xbf16, #tpu.memory_space<vmem>>, %arg2: memref<1x32xf32, #tpu.memory_space<vmem>>, %arg3: memref<1x32xf32, #tpu.memory_space<vmem>>, %arg4: memref<16x32xbf16, #tpu.memory_space<vmem>>) attributes {dimension_semantics = [#tpu.dimension_semantics<parallel>], iteration_bounds = array<i64: 1>, scalar_prefetch = 0 : i64, scratch_operands = 0 : i64, tpu.core_type = #tpu.core_type<tc>, window_params = [{transform_indices = @transform_0, window_bounds = array<i64: 16, 32>}, {pipeline_mode = #tpu.pipeline_mode<synchronous>, transform_indices = @transform_1, window_bounds = array<i64: 1, 32>}, {pipeline_mode = #tpu.pipeline_mode<synchronous>, transform_indices = @transform_2, window_bounds = array<i64: 1, 32>}, {transform_indices = @transform_3, window_bounds = array<i64: 16, 32>}]} {
    %c0 = arith.constant 0 : index
    %c0_0 = arith.constant 0 : index
    %0 = vector.load %arg1[%c0, %c0_0] : memref<16x32xbf16, #tpu.memory_space<vmem>>, vector<16x32xbf16>
    %1 = arith.extf %0 : vector<16x32xbf16> to vector<16x32xf32>
    %c0_1 = arith.constant 0 : index
    %c0_2 = arith.constant 0 : index
    %2 = vector.load %arg2[%c0_1, %c0_2] : memref<1x32xf32, #tpu.memory_space<vmem>>, vector<1x32xf32>
    %c0_3 = arith.constant 0 : index
    %c0_4 = arith.constant 0 : index
    %3 = vector.load %arg3[%c0_3, %c0_4] : memref<1x32xf32, #tpu.memory_space<vmem>>, vector<1x32xf32>
    %cst = arith.constant dense<0.000000e+00> : vector<16xf32>
    %4 = vector.multi_reduction <add>, %1, %cst [1] : vector<16x32xf32> to vector<16xf32>
    %5 = vector.shape_cast %4 : vector<16xf32> to vector<16x1xf32>
    %cst_5 = arith.constant 3.200000e+01 : f32
    %6 = vector.broadcast %cst_5 : f32 to vector<16x1xf32>
    %7 = arith.divf %5, %6 : vector<16x1xf32>
    %8 = vector.broadcast %7 : vector<16x1xf32> to vector<16x32xf32>
    %9 = arith.subf %1, %8 : vector<16x32xf32>
    %10 = arith.mulf %9, %9 : vector<16x32xf32>
    %cst_6 = arith.constant dense<0.000000e+00> : vector<16xf32>
    %11 = vector.multi_reduction <add>, %10, %cst_6 [1] : vector<16x32xf32> to vector<16xf32>
    %12 = vector.shape_cast %11 : vector<16xf32> to vector<16x1xf32>
    %cst_7 = arith.constant 3.200000e+01 : f32
    %13 = vector.broadcast %cst_7 : f32 to vector<16x1xf32>
    %14 = arith.divf %12, %13 : vector<16x1xf32>
    %cst_8 = arith.constant 9.99999974E-6 : f32
    %15 = vector.broadcast %cst_8 : f32 to vector<16x1xf32>
    %16 = arith.addf %14, %15 : vector<16x1xf32>
    %17 = math.rsqrt %16 : vector<16x1xf32>
    %18 = vector.broadcast %17 : vector<16x1xf32> to vector<16x32xf32>
    %19 = arith.mulf %9, %18 : vector<16x32xf32>
    %20 = vector.broadcast %2 : vector<1x32xf32> to vector<16x32xf32>
    %21 = arith.mulf %19, %20 : vector<16x32xf32>
    %22 = vector.broadcast %3 : vector<1x32xf32> to vector<16x32xf32>
    %23 = arith.addf %21, %22 : vector<16x32xf32>
    %24 = arith.truncf %23 : vector<16x32xf32> to vector<16x32xbf16>
    %c0_9 = arith.constant 0 : index
    %c0_10 = arith.constant 0 : index
    %25 = vector.load %arg4[%c0_9, %c0_10] : memref<16x32xbf16, #tpu.memory_space<vmem>>, vector<16x32xbf16>
    tpu.vector_store %arg4[%c0_9, %c0_10], %24 {strides = array<i32>} : memref<16x32xbf16, #tpu.memory_space<vmem>>, vector<16x32xbf16>,
    return
  }
  func.func @transform_0(%arg0: i32) -> (i32, i32) {
    %c0_i32 = arith.constant 0 : i32
    %c0_i32_0 = arith.constant 0 : i32
    return %arg0, %c0_i32 : i32, i32
  }
  func.func @transform_1(%arg0: i32) -> (i32, i32) {
    %c0_i32 = arith.constant 0 : i32
    %c0_i32_0 = arith.constant 0 : i32
    %c0_i32_1 = arith.constant 0 : i32
    return %c0_i32, %c0_i32_0 : i32, i32
  }
  func.func @transform_2(%arg0: i32) -> (i32, i32) {
    %c0_i32 = arith.constant 0 : i32
    %c0_i32_0 = arith.constant 0 : i32
    %c0_i32_1 = arith.constant 0 : i32
    return %c0_i32, %c0_i32_0 : i32, i32
  }
  func.func @transform_3(%arg0: i32) -> (i32, i32) {
    %c0_i32 = arith.constant 0 : i32
    %c0_i32_0 = arith.constant 0 : i32
    return %arg0, %c0_i32 : i32, i32
  }
}

module attributes {stable_mosaic.version = 11 : i64} {
  func.func @_self_attn_kernel(%arg0: i32, %arg1: i32, %arg2: memref<1x8x32xbf16, #tpu.memory_space<vmem>>, %arg3: memref<1x32x8xbf16, #tpu.memory_space<vmem>>, %arg4: memref<1x32x8xbf16, #tpu.memory_space<vmem>>, %arg5: memref<1x32x8xbf16, #tpu.memory_space<vmem>>, %arg6: memref<1x1x8xf32, #tpu.memory_space<vmem>>, %arg7: memref<1x1x8xf32, #tpu.memory_space<vmem>>, %arg8: memref<1x1x8xf32, #tpu.memory_space<vmem>>, %arg9: memref<1x1x8x8xbf16, #tpu.memory_space<vmem>>) attributes {dimension_semantics = [#tpu.dimension_semantics<parallel>, #tpu.dimension_semantics<parallel>], iteration_bounds = array<i64: 2, 4>, scalar_prefetch = 0 : i64, scratch_operands = 0 : i64, tpu.core_type = #tpu.core_type<tc>, window_params = [{transform_indices = @transform_0, window_bounds = array<i64: 1, 8, 32>}, {transform_indices = @transform_1, window_bounds = array<i64: 1, 32, 8>}, {transform_indices = @transform_2, window_bounds = array<i64: 1, 32, 8>}, {transform_indices = @transform_3, window_bounds = array<i64: 1, 32, 8>}, {transform_indices = @transform_4, window_bounds = array<i64: 1, 1, 8>}, {transform_indices = @transform_5, window_bounds = array<i64: 1, 1, 8>}, {transform_indices = @transform_6, window_bounds = array<i64: 1, 1, 8>}, {transform_indices = @transform_7, window_bounds = array<i64: 1, 1, 8, 8>}]} {
    %c0 = arith.constant 0 : index
    %c0_0 = arith.constant 0 : index
    %c0_1 = arith.constant 0 : index
    %0 = vector.load %arg2[%c0, %c0_0, %c0_1] : memref<1x8x32xbf16, #tpu.memory_space<vmem>>, vector<1x8x32xbf16>
    %1 = vector.shape_cast %0 : vector<1x8x32xbf16> to vector<8x32xbf16>
    %c0_2 = arith.constant 0 : index
    %c0_3 = arith.constant 0 : index
    %c0_4 = arith.constant 0 : index
    %2 = vector.load %arg3[%c0_2, %c0_3, %c0_4] : memref<1x32x8xbf16, #tpu.memory_space<vmem>>, vector<1x32x8xbf16>
    %3 = vector.shape_cast %2 : vector<1x32x8xbf16> to vector<32x8xbf16>
    %cst = arith.constant dense<0.000000e+00> : vector<8x8xf32>
    %4 = tpu.matmul %1, %3, %cst {dimension_numbers = #tpu.dot_dimension_numbers<[1], [0], [0], [1], [0, 0, 1, 1], [], []>} : vector<8x32xbf16>, vector<32x8xbf16>, vector<8x8xf32> -> vector<8x8xf32>
    %c0_5 = arith.constant 0 : index
    %c0_6 = arith.constant 0 : index
    %c0_7 = arith.constant 0 : index
    %5 = vector.load %arg6[%c0_5, %c0_6, %c0_7] : memref<1x1x8xf32, #tpu.memory_space<vmem>>, vector<1x1x8xf32>
    %6 = vector.shape_cast %5 : vector<1x1x8xf32> to vector<1x8xf32>
    %7 = vector.broadcast %6 : vector<1x8xf32> to vector<8x8xf32>
    %8 = arith.addf %4, %7 : vector<8x8xf32>
    %c0_8 = arith.constant 0 : index
    %c0_9 = arith.constant 0 : index
    %c0_10 = arith.constant 0 : index
    %9 = vector.load %arg4[%c0_8, %c0_9, %c0_10] : memref<1x32x8xbf16, #tpu.memory_space<vmem>>, vector<1x32x8xbf16>
    %10 = vector.shape_cast %9 : vector<1x32x8xbf16> to vector<32x8xbf16>
    %cst_11 = arith.constant dense<0.000000e+00> : vector<8x8xf32>
    %11 = tpu.matmul %1, %10, %cst_11 {dimension_numbers = #tpu.dot_dimension_numbers<[1], [0], [0], [1], [0, 0, 1, 1], [], []>} : vector<8x32xbf16>, vector<32x8xbf16>, vector<8x8xf32> -> vector<8x8xf32>
    %c0_12 = arith.constant 0 : index
    %c0_13 = arith.constant 0 : index
    %c0_14 = arith.constant 0 : index
    %12 = vector.load %arg7[%c0_12, %c0_13, %c0_14] : memref<1x1x8xf32, #tpu.memory_space<vmem>>, vector<1x1x8xf32>
    %13 = vector.shape_cast %12 : vector<1x1x8xf32> to vector<1x8xf32>
    %14 = vector.broadcast %13 : vector<1x8xf32> to vector<8x8xf32>
    %15 = arith.addf %11, %14 : vector<8x8xf32>
    %c0_15 = arith.constant 0 : index
    %c0_16 = arith.constant 0 : index
    %c0_17 = arith.constant 0 : index
    %16 = vector.load %arg5[%c0_15, %c0_16, %c0_17] : memref<1x32x8xbf16, #tpu.memory_space<vmem>>, vector<1x32x8xbf16>
    %17 = vector.shape_cast %16 : vector<1x32x8xbf16> to vector<32x8xbf16>
    %cst_18 = arith.constant dense<0.000000e+00> : vector<8x8xf32>
    %18 = tpu.matmul %1, %17, %cst_18 {dimension_numbers = #tpu.dot_dimension_numbers<[1], [0], [0], [1], [0, 0, 1, 1], [], []>} : vector<8x32xbf16>, vector<32x8xbf16>, vector<8x8xf32> -> vector<8x8xf32>
    %c0_19 = arith.constant 0 : index
    %c0_20 = arith.constant 0 : index
    %c0_21 = arith.constant 0 : index
    %19 = vector.load %arg8[%c0_19, %c0_20, %c0_21] : memref<1x1x8xf32, #tpu.memory_space<vmem>>, vector<1x1x8xf32>
    %20 = vector.shape_cast %19 : vector<1x1x8xf32> to vector<1x8xf32>
    %21 = vector.broadcast %20 : vector<1x8xf32> to vector<8x8xf32>
    %22 = arith.addf %18, %21 : vector<8x8xf32>
    %23 = arith.truncf %8 : vector<8x8xf32> to vector<8x8xbf16>
    %24 = arith.truncf %15 : vector<8x8xf32> to vector<8x8xbf16>
    "tpu.trace_start"() <{level = 10 : i32, message = "qd,kd->qk"}> : () -> ()
    %cst_22 = arith.constant dense<0.000000e+00> : vector<8x8xf32>
    %25 = tpu.matmul %23, %24, %cst_22 {dimension_numbers = #tpu.dot_dimension_numbers<[1], [1], [0], [0], [0, 0, 1, 0], [], []>} : vector<8x8xbf16>, vector<8x8xbf16>, vector<8x8xf32> -> vector<8x8xf32>
    "tpu.trace_stop"() : () -> ()
    %cst_23 = arith.constant 0.353553385 : f32
    %26 = vector.broadcast %cst_23 : f32 to vector<8x8xf32>
    %27 = arith.mulf %25, %26 : vector<8x8xf32>
    %cst_24 = arith.constant dense<0xFF800000> : vector<8xf32>
    %28 = vector.multi_reduction <maximumf>, %27, %cst_24 [1] : vector<8x8xf32> to vector<8xf32>
    %29 = vector.shape_cast %28 : vector<8xf32> to vector<8x1xf32>
    %30 = vector.broadcast %29 : vector<8x1xf32> to vector<8x8xf32>
    %31 = arith.subf %27, %30 : vector<8x8xf32>
    %32 = math.exp %31 : vector<8x8xf32>
    %cst_25 = arith.constant dense<0.000000e+00> : vector<8xf32>
    %33 = vector.multi_reduction <add>, %32, %cst_25 [1] : vector<8x8xf32> to vector<8xf32>
    %34 = vector.shape_cast %33 : vector<8xf32> to vector<8x1xf32>
    %35 = tpu.reciprocal %34 {approx = true} : vector<8x1xf32> -> vector<8x1xf32>
    %36 = vector.broadcast %35 : vector<8x1xf32> to vector<8x8xf32>
    %37 = arith.mulf %32, %36 : vector<8x8xf32>
    %38 = arith.truncf %37 : vector<8x8xf32> to vector<8x8xbf16>
    %39 = arith.truncf %22 : vector<8x8xf32> to vector<8x8xbf16>
    %cst_26 = arith.constant dense<0.000000e+00> : vector<8x8xf32>
    %40 = tpu.matmul %38, %39, %cst_26 {dimension_numbers = #tpu.dot_dimension_numbers<[1], [0], [0], [1], [0, 0, 1, 1], [], []>} : vector<8x8xbf16>, vector<8x8xbf16>, vector<8x8xf32> -> vector<8x8xf32>
    %41 = arith.truncf %40 : vector<8x8xf32> to vector<8x8xbf16>
    %c0_27 = arith.constant 0 : index
    %c0_28 = arith.constant 0 : index
    %c0_29 = arith.constant 0 : index
    %c0_30 = arith.constant 0 : index
    %42 = vector.load %arg9[%c0_27, %c0_28, %c0_29, %c0_30] : memref<1x1x8x8xbf16, #tpu.memory_space<vmem>>, vector<1x1x8x8xbf16>
    %43 = vector.shape_cast %42 : vector<1x1x8x8xbf16> to vector<8x8xbf16>
    %44 = vector.shape_cast %41 : vector<8x8xbf16> to vector<1x1x8x8xbf16>
    tpu.vector_store %arg9[%c0_27, %c0_28, %c0_29, %c0_30], %44 {strides = array<i32>} : memref<1x1x8x8xbf16, #tpu.memory_space<vmem>>, vector<1x1x8x8xbf16>,
    return
  }
  func.func @transform_0(%arg0: i32, %arg1: i32) -> (i32, i32, i32) {
    %c0_i32 = arith.constant 0 : i32
    %c0_i32_0 = arith.constant 0 : i32
    %c0_i32_1 = arith.constant 0 : i32
    return %arg0, %c0_i32, %c0_i32_0 : i32, i32, i32
  }
  func.func @transform_1(%arg0: i32, %arg1: i32) -> (i32, i32, i32) {
    %c0_i32 = arith.constant 0 : i32
    %c0_i32_0 = arith.constant 0 : i32
    %c0_i32_1 = arith.constant 0 : i32
    return %arg1, %c0_i32, %c0_i32_0 : i32, i32, i32
  }
  func.func @transform_2(%arg0: i32, %arg1: i32) -> (i32, i32, i32) {
    %c0_i32 = arith.constant 0 : i32
    %c0_i32_0 = arith.constant 0 : i32
    %c0_i32_1 = arith.constant 0 : i32
    return %arg1, %c0_i32, %c0_i32_0 : i32, i32, i32
  }
  func.func @transform_3(%arg0: i32, %arg1: i32) -> (i32, i32, i32) {
    %c0_i32 = arith.constant 0 : i32
    %c0_i32_0 = arith.constant 0 : i32
    %c0_i32_1 = arith.constant 0 : i32
    return %arg1, %c0_i32, %c0_i32_0 : i32, i32, i32
  }
  func.func @transform_4(%arg0: i32, %arg1: i32) -> (i32, i32, i32) {
    %c0_i32 = arith.constant 0 : i32
    %c0_i32_0 = arith.constant 0 : i32
    %c0_i32_1 = arith.constant 0 : i32
    return %arg1, %c0_i32, %c0_i32_0 : i32, i32, i32
  }
  func.func @transform_5(%arg0: i32, %arg1: i32) -> (i32, i32, i32) {
    %c0_i32 = arith.constant 0 : i32
    %c0_i32_0 = arith.constant 0 : i32
    %c0_i32_1 = arith.constant 0 : i32
    return %arg1, %c0_i32, %c0_i32_0 : i32, i32, i32
  }
  func.func @transform_6(%arg0: i32, %arg1: i32) -> (i32, i32, i32) {
    %c0_i32 = arith.constant 0 : i32
    %c0_i32_0 = arith.constant 0 : i32
    %c0_i32_1 = arith.constant 0 : i32
    return %arg1, %c0_i32, %c0_i32_0 : i32, i32, i32
  }
  func.func @transform_7(%arg0: i32, %arg1: i32) -> (i32, i32, i32, i32) {
    %c0_i32 = arith.constant 0 : i32
    %c0_i32_0 = arith.constant 0 : i32
    %c0_i32_1 = arith.constant 0 : i32
    return %arg0, %arg1, %c0_i32, %c0_i32_0 : i32, i32, i32, i32
  }
}

module attributes {stable_mosaic.version = 11 : i64} {
  func.func @_cross_attn_kernel(%arg0: i32, %arg1: i32, %arg2: memref<1x8x32xbf16, #tpu.memory_space<vmem>>, %arg3: memref<1x8x32xbf16, #tpu.memory_space<vmem>>, %arg4: memref<1x32x8xbf16, #tpu.memory_space<vmem>>, %arg5: memref<1x32x8xbf16, #tpu.memory_space<vmem>>, %arg6: memref<1x32x8xbf16, #tpu.memory_space<vmem>>, %arg7: memref<1x1x8xf32, #tpu.memory_space<vmem>>, %arg8: memref<1x1x8xf32, #tpu.memory_space<vmem>>, %arg9: memref<1x1x8xf32, #tpu.memory_space<vmem>>, %arg10: memref<1x1x8x8xbf16, #tpu.memory_space<vmem>>) attributes {dimension_semantics = [#tpu.dimension_semantics<parallel>, #tpu.dimension_semantics<parallel>], iteration_bounds = array<i64: 2, 4>, scalar_prefetch = 0 : i64, scratch_operands = 0 : i64, tpu.core_type = #tpu.core_type<tc>, window_params = [{transform_indices = @transform_0, window_bounds = array<i64: 1, 8, 32>}, {transform_indices = @transform_1, window_bounds = array<i64: 1, 8, 32>}, {transform_indices = @transform_2, window_bounds = array<i64: 1, 32, 8>}, {transform_indices = @transform_3, window_bounds = array<i64: 1, 32, 8>}, {transform_indices = @transform_4, window_bounds = array<i64: 1, 32, 8>}, {transform_indices = @transform_5, window_bounds = array<i64: 1, 1, 8>}, {transform_indices = @transform_6, window_bounds = array<i64: 1, 1, 8>}, {transform_indices = @transform_7, window_bounds = array<i64: 1, 1, 8>}, {transform_indices = @transform_8, window_bounds = array<i64: 1, 1, 8, 8>}]} {
    %c0 = arith.constant 0 : index
    %c0_0 = arith.constant 0 : index
    %c0_1 = arith.constant 0 : index
    %0 = vector.load %arg2[%c0, %c0_0, %c0_1] : memref<1x8x32xbf16, #tpu.memory_space<vmem>>, vector<1x8x32xbf16>
    %1 = vector.shape_cast %0 : vector<1x8x32xbf16> to vector<8x32xbf16>
    %c0_2 = arith.constant 0 : index
    %c0_3 = arith.constant 0 : index
    %c0_4 = arith.constant 0 : index
    %2 = vector.load %arg4[%c0_2, %c0_3, %c0_4] : memref<1x32x8xbf16, #tpu.memory_space<vmem>>, vector<1x32x8xbf16>
    %3 = vector.shape_cast %2 : vector<1x32x8xbf16> to vector<32x8xbf16>
    %cst = arith.constant dense<0.000000e+00> : vector<8x8xf32>
    %4 = tpu.matmul %1, %3, %cst {dimension_numbers = #tpu.dot_dimension_numbers<[1], [0], [0], [1], [0, 0, 1, 1], [], []>} : vector<8x32xbf16>, vector<32x8xbf16>, vector<8x8xf32> -> vector<8x8xf32>
    %c0_5 = arith.constant 0 : index
    %c0_6 = arith.constant 0 : index
    %c0_7 = arith.constant 0 : index
    %5 = vector.load %arg7[%c0_5, %c0_6, %c0_7] : memref<1x1x8xf32, #tpu.memory_space<vmem>>, vector<1x1x8xf32>
    %6 = vector.shape_cast %5 : vector<1x1x8xf32> to vector<1x8xf32>
    %7 = vector.broadcast %6 : vector<1x8xf32> to vector<8x8xf32>
    %8 = arith.addf %4, %7 : vector<8x8xf32>
    %c0_8 = arith.constant 0 : index
    %c0_9 = arith.constant 0 : index
    %c0_10 = arith.constant 0 : index
    %9 = vector.load %arg3[%c0_8, %c0_9, %c0_10] : memref<1x8x32xbf16, #tpu.memory_space<vmem>>, vector<1x8x32xbf16>
    %10 = vector.shape_cast %9 : vector<1x8x32xbf16> to vector<8x32xbf16>
    %c0_11 = arith.constant 0 : index
    %c0_12 = arith.constant 0 : index
    %c0_13 = arith.constant 0 : index
    %11 = vector.load %arg5[%c0_11, %c0_12, %c0_13] : memref<1x32x8xbf16, #tpu.memory_space<vmem>>, vector<1x32x8xbf16>
    %12 = vector.shape_cast %11 : vector<1x32x8xbf16> to vector<32x8xbf16>
    %cst_14 = arith.constant dense<0.000000e+00> : vector<8x8xf32>
    %13 = tpu.matmul %10, %12, %cst_14 {dimension_numbers = #tpu.dot_dimension_numbers<[1], [0], [0], [1], [0, 0, 1, 1], [], []>} : vector<8x32xbf16>, vector<32x8xbf16>, vector<8x8xf32> -> vector<8x8xf32>
    %c0_15 = arith.constant 0 : index
    %c0_16 = arith.constant 0 : index
    %c0_17 = arith.constant 0 : index
    %14 = vector.load %arg8[%c0_15, %c0_16, %c0_17] : memref<1x1x8xf32, #tpu.memory_space<vmem>>, vector<1x1x8xf32>
    %15 = vector.shape_cast %14 : vector<1x1x8xf32> to vector<1x8xf32>
    %16 = vector.broadcast %15 : vector<1x8xf32> to vector<8x8xf32>
    %17 = arith.addf %13, %16 : vector<8x8xf32>
    %c0_18 = arith.constant 0 : index
    %c0_19 = arith.constant 0 : index
    %c0_20 = arith.constant 0 : index
    %18 = vector.load %arg3[%c0_18, %c0_19, %c0_20] : memref<1x8x32xbf16, #tpu.memory_space<vmem>>, vector<1x8x32xbf16>
    %19 = vector.shape_cast %18 : vector<1x8x32xbf16> to vector<8x32xbf16>
    %c0_21 = arith.constant 0 : index
    %c0_22 = arith.constant 0 : index
    %c0_23 = arith.constant 0 : index
    %20 = vector.load %arg6[%c0_21, %c0_22, %c0_23] : memref<1x32x8xbf16, #tpu.memory_space<vmem>>, vector<1x32x8xbf16>
    %21 = vector.shape_cast %20 : vector<1x32x8xbf16> to vector<32x8xbf16>
    %cst_24 = arith.constant dense<0.000000e+00> : vector<8x8xf32>
    %22 = tpu.matmul %19, %21, %cst_24 {dimension_numbers = #tpu.dot_dimension_numbers<[1], [0], [0], [1], [0, 0, 1, 1], [], []>} : vector<8x32xbf16>, vector<32x8xbf16>, vector<8x8xf32> -> vector<8x8xf32>
    %c0_25 = arith.constant 0 : index
    %c0_26 = arith.constant 0 : index
    %c0_27 = arith.constant 0 : index
    %23 = vector.load %arg9[%c0_25, %c0_26, %c0_27] : memref<1x1x8xf32, #tpu.memory_space<vmem>>, vector<1x1x8xf32>
    %24 = vector.shape_cast %23 : vector<1x1x8xf32> to vector<1x8xf32>
    %25 = vector.broadcast %24 : vector<1x8xf32> to vector<8x8xf32>
    %26 = arith.addf %22, %25 : vector<8x8xf32>
    %27 = arith.truncf %8 : vector<8x8xf32> to vector<8x8xbf16>
    %28 = arith.truncf %17 : vector<8x8xf32> to vector<8x8xbf16>
    "tpu.trace_start"() <{level = 10 : i32, message = "qd,kd->qk"}> : () -> ()
    %cst_28 = arith.constant dense<0.000000e+00> : vector<8x8xf32>
    %29 = tpu.matmul %27, %28, %cst_28 {dimension_numbers = #tpu.dot_dimension_numbers<[1], [1], [0], [0], [0, 0, 1, 0], [], []>} : vector<8x8xbf16>, vector<8x8xbf16>, vector<8x8xf32> -> vector<8x8xf32>
    "tpu.trace_stop"() : () -> ()
    %cst_29 = arith.constant 0.353553385 : f32
    %30 = vector.broadcast %cst_29 : f32 to vector<8x8xf32>
    %31 = arith.mulf %29, %30 : vector<8x8xf32>
    %cst_30 = arith.constant dense<0xFF800000> : vector<8xf32>
    %32 = vector.multi_reduction <maximumf>, %31, %cst_30 [1] : vector<8x8xf32> to vector<8xf32>
    %33 = vector.shape_cast %32 : vector<8xf32> to vector<8x1xf32>
    %34 = vector.broadcast %33 : vector<8x1xf32> to vector<8x8xf32>
    %35 = arith.subf %31, %34 : vector<8x8xf32>
    %36 = math.exp %35 : vector<8x8xf32>
    %cst_31 = arith.constant dense<0.000000e+00> : vector<8xf32>
    %37 = vector.multi_reduction <add>, %36, %cst_31 [1] : vector<8x8xf32> to vector<8xf32>
    %38 = vector.shape_cast %37 : vector<8xf32> to vector<8x1xf32>
    %39 = tpu.reciprocal %38 {approx = true} : vector<8x1xf32> -> vector<8x1xf32>
    %40 = vector.broadcast %39 : vector<8x1xf32> to vector<8x8xf32>
    %41 = arith.mulf %36, %40 : vector<8x8xf32>
    %42 = arith.truncf %41 : vector<8x8xf32> to vector<8x8xbf16>
    %43 = arith.truncf %26 : vector<8x8xf32> to vector<8x8xbf16>
    %cst_32 = arith.constant dense<0.000000e+00> : vector<8x8xf32>
    %44 = tpu.matmul %42, %43, %cst_32 {dimension_numbers = #tpu.dot_dimension_numbers<[1], [0], [0], [1], [0, 0, 1, 1], [], []>} : vector<8x8xbf16>, vector<8x8xbf16>, vector<8x8xf32> -> vector<8x8xf32>
    %45 = arith.truncf %44 : vector<8x8xf32> to vector<8x8xbf16>
    %c0_33 = arith.constant 0 : index
    %c0_34 = arith.constant 0 : index
    %c0_35 = arith.constant 0 : index
    %c0_36 = arith.constant 0 : index
    %46 = vector.load %arg10[%c0_33, %c0_34, %c0_35, %c0_36] : memref<1x1x8x8xbf16, #tpu.memory_space<vmem>>, vector<1x1x8x8xbf16>
    %47 = vector.shape_cast %46 : vector<1x1x8x8xbf16> to vector<8x8xbf16>
    %48 = vector.shape_cast %45 : vector<8x8xbf16> to vector<1x1x8x8xbf16>
    tpu.vector_store %arg10[%c0_33, %c0_34, %c0_35, %c0_36], %48 {strides = array<i32>} : memref<1x1x8x8xbf16, #tpu.memory_space<vmem>>, vector<1x1x8x8xbf16>,
    return
  }
  func.func @transform_0(%arg0: i32, %arg1: i32) -> (i32, i32, i32) {
    %c0_i32 = arith.constant 0 : i32
    %c0_i32_0 = arith.constant 0 : i32
    %c0_i32_1 = arith.constant 0 : i32
    return %arg0, %c0_i32, %c0_i32_0 : i32, i32, i32
  }
  func.func @transform_1(%arg0: i32, %arg1: i32) -> (i32, i32, i32) {
    %c0_i32 = arith.constant 0 : i32
    %c0_i32_0 = arith.constant 0 : i32
    %c0_i32_1 = arith.constant 0 : i32
    return %arg0, %c0_i32, %c0_i32_0 : i32, i32, i32
  }
  func.func @transform_2(%arg0: i32, %arg1: i32) -> (i32, i32, i32) {
    %c0_i32 = arith.constant 0 : i32
    %c0_i32_0 = arith.constant 0 : i32
    %c0_i32_1 = arith.constant 0 : i32
    return %arg1, %c0_i32, %c0_i32_0 : i32, i32, i32
  }
  func.func @transform_3(%arg0: i32, %arg1: i32) -> (i32, i32, i32) {
    %c0_i32 = arith.constant 0 : i32
    %c0_i32_0 = arith.constant 0 : i32
    %c0_i32_1 = arith.constant 0 : i32
    return %arg1, %c0_i32, %c0_i32_0 : i32, i32, i32
  }
  func.func @transform_4(%arg0: i32, %arg1: i32) -> (i32, i32, i32) {
    %c0_i32 = arith.constant 0 : i32
    %c0_i32_0 = arith.constant 0 : i32
    %c0_i32_1 = arith.constant 0 : i32
    return %arg1, %c0_i32, %c0_i32_0 : i32, i32, i32
  }
  func.func @transform_5(%arg0: i32, %arg1: i32) -> (i32, i32, i32) {
    %c0_i32 = arith.constant 0 : i32
    %c0_i32_0 = arith.constant 0 : i32
    %c0_i32_1 = arith.constant 0 : i32
    return %arg1, %c0_i32, %c0_i32_0 : i32, i32, i32
  }
  func.func @transform_6(%arg0: i32, %arg1: i32) -> (i32, i32, i32) {
    %c0_i32 = arith.constant 0 : i32
    %c0_i32_0 = arith.constant 0 : i32
    %c0_i32_1 = arith.constant 0 : i32
    return %arg1, %c0_i32, %c0_i32_0 : i32, i32, i32
  }
  func.func @transform_7(%arg0: i32, %arg1: i32) -> (i32, i32, i32) {
    %c0_i32 = arith.constant 0 : i32
    %c0_i32_0 = arith.constant 0 : i32
    %c0_i32_1 = arith.constant 0 : i32
    return %arg1, %c0_i32, %c0_i32_0 : i32, i32, i32
  }
  func.func @transform_8(%arg0: i32, %arg1: i32) -> (i32, i32, i32, i32) {
    %c0_i32 = arith.constant 0 : i32
    %c0_i32_0 = arith.constant 0 : i32
    %c0_i32_1 = arith.constant 0 : i32
    return %arg0, %arg1, %c0_i32, %c0_i32_0 : i32, i32, i32, i32
  }
}

module attributes {stable_mosaic.version = 11 : i64} {
  func.func @_linear_kernel(%arg0: i32, %arg1: i32, %arg2: memref<16x32xbf16, #tpu.memory_space<vmem>>, %arg3: memref<32x16xbf16, #tpu.memory_space<vmem>>, %arg4: memref<1x16xf32, #tpu.memory_space<vmem>>, %arg5: memref<16x16xf32, #tpu.memory_space<vmem>>) attributes {dimension_semantics = [#tpu.dimension_semantics<parallel>, #tpu.dimension_semantics<parallel>], iteration_bounds = array<i64: 1, 1>, scalar_prefetch = 0 : i64, scratch_operands = 0 : i64, tpu.core_type = #tpu.core_type<tc>, window_params = [{transform_indices = @transform_0, window_bounds = array<i64: 16, 32>}, {transform_indices = @transform_1, window_bounds = array<i64: 32, 16>}, {transform_indices = @transform_2, window_bounds = array<i64: 1, 16>}, {transform_indices = @transform_3, window_bounds = array<i64: 16, 16>}]} {
    %c0 = arith.constant 0 : index
    %c0_0 = arith.constant 0 : index
    %0 = vector.load %arg2[%c0, %c0_0] : memref<16x32xbf16, #tpu.memory_space<vmem>>, vector<16x32xbf16>
    %c0_1 = arith.constant 0 : index
    %c0_2 = arith.constant 0 : index
    %1 = vector.load %arg3[%c0_1, %c0_2] : memref<32x16xbf16, #tpu.memory_space<vmem>>, vector<32x16xbf16>
    %cst = arith.constant dense<0.000000e+00> : vector<16x16xf32>
    %2 = tpu.matmul %0, %1, %cst {dimension_numbers = #tpu.dot_dimension_numbers<[1], [0], [0], [1], [0, 0, 1, 1], [], []>} : vector<16x32xbf16>, vector<32x16xbf16>, vector<16x16xf32> -> vector<16x16xf32>
    %c0_3 = arith.constant 0 : index
    %c0_4 = arith.constant 0 : index
    %3 = vector.load %arg4[%c0_3, %c0_4] : memref<1x16xf32, #tpu.memory_space<vmem>>, vector<1x16xf32>
    %4 = vector.broadcast %3 : vector<1x16xf32> to vector<16x16xf32>
    %5 = arith.addf %2, %4 : vector<16x16xf32>
    %c0_5 = arith.constant 0 : index
    %c0_6 = arith.constant 0 : index
    %6 = vector.load %arg5[%c0_5, %c0_6] : memref<16x16xf32, #tpu.memory_space<vmem>>, vector<16x16xf32>
    tpu.vector_store %arg5[%c0_5, %c0_6], %5 {strides = array<i32>} : memref<16x16xf32, #tpu.memory_space<vmem>>, vector<16x16xf32>,
    return
  }
  func.func @transform_0(%arg0: i32, %arg1: i32) -> (i32, i32) {
    %c0_i32 = arith.constant 0 : i32
    %c0_i32_0 = arith.constant 0 : i32
    return %arg1, %c0_i32 : i32, i32
  }
  func.func @transform_1(%arg0: i32, %arg1: i32) -> (i32, i32) {
    %c0_i32 = arith.constant 0 : i32
    %c0_i32_0 = arith.constant 0 : i32
    return %c0_i32, %arg0 : i32, i32
  }
  func.func @transform_2(%arg0: i32, %arg1: i32) -> (i32, i32) {
    %c0_i32 = arith.constant 0 : i32
    %c0_i32_0 = arith.constant 0 : i32
    return %c0_i32, %arg0 : i32, i32
  }
  func.func @transform_3(%arg0: i32, %arg1: i32) -> (i32, i32) {
    %c0_i32 = arith.constant 0 : i32
    return %arg1, %arg0 : i32, i32
  }
}

</mosaic_0001>

<bundles_post_ra>
// kernel: transformer_forward.25
= control target key start
LH: loop header
LB: loop body
LE: loop exit
PB: predicated region body
PF: predicated region fallthrough
CT: control target
= control target key end

     0   :  { %vm20_vm0 = vcmask 261120   ;;  %vm72_vm1 = vcmask 257024   ;;  %s132_s0 = inlined_call_operand.vmem [shape: bf16[16,32], index: 0, kind: input, shape index: {}]   ;;  %s133_s1 = inlined_call_operand.vmem [shape: f32[1,32], index: 1, kind: input, shape index: {}]   ;;  %s134_s2 = inlined_call_operand.vmem [shape: f32[1,32], index: 2, kind: input, shape index: {}]   ;;  %s135_s3 = inlined_call_operand.vmem [shape: bf16[16,32], index: 3, kind: output, shape index: {}]  }
   0x1   :  { %v86_v0 = vld [vmem:[%s132_s0] sm:$0xff]  }
   0x2   :  { %v87_v1 = vunpack.c.l.bf16 %v86_v0  ;;  %v88_v2 = vunpack.c.h.bf16 %v86_v0  ;;  %v79_v22 = vld [vmem:[%s133_s1] ss:$0 sm:$0xff] }
   0x3   :  { %v80_v24 = vld [vmem:[%s134_s2] ss:$0 sm:$0xff] }
   0x4   :  { %v21_v3 = vsel %vm20_vm0, %v87_v1, 0.0  ;;  %v24_v4 = vsel %vm20_vm0, %v88_v2, 0.0 }
   0x5   :  { %22 = vadd.xlane.f32.xlu0 %v21_v3 }
   0x9   :  { %25 = vadd.xlane.f32.xlu0 %v24_v4 }
  0x92   :  { %v23_v5 = vpop.xlane.xlu0 %22 }
  0x93   :  { %v28_v6 = vmul.f32 0.03125, %v23_v5 }
  0x95   :  { %v30_v7 = vsub.f32 %v87_v1, %v28_v6 }
  0x96   :  { %v26_v8 = vpop.xlane.xlu0 %25 }
  0x97   :  { %v29_v9 = vmul.f32 0.03125, %v26_v8  ;;  %v32_v10 = vmul.f32 %v30_v7, %v30_v7 }
  0x99   :  { %v31_v11 = vsub.f32 %v88_v2, %v29_v9  ;;  %v34_v12 = vsel %vm20_vm0, %v32_v10, 0.0 }
  0x9a   :  { %35 = vadd.xlane.f32.xlu1 %v34_v12 }
  0x9b   :  { %v33_v13 = vmul.f32 %v31_v11, %v31_v11 }
  0x9d   :  { %v37_v14 = vsel %vm20_vm0, %v33_v13, 0.0 }
  0x9e   :  { %38 = vadd.xlane.f32.xlu1 %v37_v14 }
 0x127   :  { %v36_v15 = vpop.xlane.xlu1 %35 }
 0x128   :  { %v40_v16 = vmul.f32 0.03125, %v36_v15 }
 0x12a   :  { %v42_v17 = vadd.f32 1e-05, %v40_v16 }
 0x12b   :  { %v39_v18 = vpop.xlane.xlu1 %38 }
 0x12c   :  { %89 = vrsqrt.f32 %v42_v17  ;;  %v41_v19 = vmul.f32 0.03125, %v39_v18 }
 0x12e   :  { %v43_v20 = vadd.f32 1e-05, %v41_v19 }
 0x130   :  { %91 = vrsqrt.f32 %v43_v20 }
 0x136   :  { %v90_v21 = vpop.eup %89 }
 0x137   :  { %v46_v23 = vmul.f32 %v90_v21, %v30_v7 }
 0x139   :  { %v54_v25 = vmul.f32 %v79_v22, %v46_v23 }
 0x13a   :  { %v92_v26 = vpop.eup %91 }
 0x13b   :  { %v62_v27 = vadd.f32 %v80_v24, %v54_v25  ;;  %v47_v28 = vmul.f32 %v92_v26, %v31_v11 }
 0x13d   :  { %v83_v29 = vpack.c.bf16 %v62_v27, %v62_v27  ;;  %v55_v30 = vmul.f32 %v79_v22, %v47_v28 }
 0x13f   :  { %73 = vst.msk [vmem:[%s135_s3] sm:$0xf] %vm72_vm1, %v83_v29  ;;  %v63_v31 = vadd.f32 %v80_v24, %v55_v30 }
 0x141   :  { %v84_v32 = vpack.c.bf16 %v63_v31, %v63_v31 }
 0x143   :  { %74 = vst.msk [vmem:[%s135_s3 + $0x4] sm:$0xf] %vm72_vm1, %v84_v32 }

// kernel: transformer_forward.21
= control target key start
LH: loop header
LB: loop body
LE: loop exit
PB: predicated region body
PF: predicated region fallthrough
CT: control target
= control target key end

     0   :  { %v312_v0 = vmov 0.0   ;;  %vm313_vm0 = vmmov 0   ;;  %vm57_vm1 = vcmask 261120   ;;  %vm144_vm2 = vcmask 523264   ;;  %s398_s1 = inlined_call_operand.vmem [shape: bf16[32,64], index: 1, kind: input, shape index: {}]   ;;  %s399_s0 = inlined_call_operand.vmem [shape: bf16[16,32], index: 0, kind: input, shape index: {}]   ;;  %s400_s3 = inlined_call_operand.vmem [shape: bf16[64,32], index: 3, kind: input, shape index: {}]   ;;  %s401_s2 = inlined_call_operand.vmem [shape: f32[1,64], index: 2, kind: input, shape index: {}]   ;;  %s402_s4 = inlined_call_operand.vmem [shape: f32[1,32], index: 4, kind: input, shape index: {}]   ;;  %s403_s5 = inlined_call_operand.vmem [shape: f32[1,32], index: 5, kind: input, shape index: {}]   ;;  %s404_s6 = inlined_call_operand.vmem [shape: f32[1,32], index: 6, kind: input, shape index: {}]   ;;  %s405_s7 = inlined_call_operand.vmem [shape: bf16[16,32], index: 7, kind: output, shape index: {}]  }
   0x1   :  { %278 = vmatprep.subr.bf16.mxu0 %v312_v0  ;;  %v300_v1 = vld [vmem:[%s398_s1] sm:$0xff]   ;;  %282 = vmatprep.mubr.msk.bf16.mxu0 %vm313_vm0, %v312_v0  ;;  %v301_v2 = vld [vmem:[%s398_s1 + $0x8] sm:$0xff]   ;;  %v305_v6 = vld [vmem:[%s400_s3 + $0x10] sm:$0xff]   ;;  %vm246_vm3 = vcmask 257024  }
   0x2   :  { %286 = vmatprep.subr.bf16.mxu1 %v312_v0  ;;  %294 = vmatprep.mubr.msk.bf16.mxu1 %vm313_vm0, %v312_v0  ;;  %v27_v3 = vld [vmem:[%s399_s0] sm:$0xff]   ;;  %v304_v5 = vld [vmem:[%s400_s3 + $0x8] sm:$0xff]   ;;  %v306_v7 = vld [vmem:[%s400_s3 + $0x18] sm:$0xff]  }
   0x3   :  { %279 = vmatpush3.bf16.msra.mxu0 %v300_v1  ;;  %v303_v4 = vld [vmem:[%s400_s3] sm:$0xff]   ;;  %v189_v19 = vunpack.c.l.bf16 %v27_v3  ;;  %v190_v23 = vunpack.c.h.bf16 %v27_v3 }
   0x4   :  { %280 = vmatprep.subr.bf16.mxu0 %v312_v0  ;;  %287 = vmatpush3.bf16.msra.mxu1 %v303_v4  ;;  %v253_v8 = vld [vmem:[%s401_s2] ss:$0 sm:$0xff] }
   0x5   :  { %288 = vmatprep.subr.bf16.mxu1 %v312_v0  ;;  %v258_v18 = vld [vmem:[%s402_s4] ss:$0 sm:$0xff] }
   0x6   :  { %v264_v48 = vld [vmem:[%s403_s5] ss:$0 sm:$0xff] }
   0x7   :  { %281 = vmatpush3.bf16.msra.mxu0 %v301_v2  ;;  %v265_v50 = vld [vmem:[%s404_s6] ss:$0 sm:$0xff] }
   0x8   :  { %289 = vmatpush3.bf16.msra.mxu1 %v304_v5 }
   0x9   :  { %290 = vmatprep.subr.bf16.mxu1 %v312_v0 }
   0xa   :  { %283 = vmatmul.mubr.msk.bf16.vlgmr.msra.gmra.mrb[0].mxu0 %vm57_vm1, %v27_v3 }
   0xc   :  { %291 = vmatpush3.bf16.msra.mxu1 %v305_v6 }
   0xd   :  { %292 = vmatprep.subr.bf16.mxu1 %v312_v0 }
  0x10   :  { %293 = vmatpush3.bf16.msra.mxu1 %v306_v7 }
  0xdd   :  { %v95_v9 = vpop.f32.mrb[0].mxu0 }
  0xde   :  { %v96_v10 = vadd.f32 %v253_v8, %v95_v9  ;;  %v284_v11 = vpop.f32.mrb[1].mxu0 }
  0xdf   :  { %v98_v12 = vpop.f32.mrb[2].mxu0 }
  0xe0   :  { %v99_v13 = vadd.f32 %v253_v8, %v98_v12  ;;  %v285_v14 = vpop.f32.mrb[3].mxu0  ;;  %v102_v15 = vmax.f32 %v96_v10, 0.0 }
  0xe2   :  { %v103_v16 = vmax.f32 %v99_v13, 0.0 }
  0xe4   :  { %v104_v17 = vpack.c.bf16 %v103_v16, %v102_v15 }
  0xe6   :  { %295 = vmatmul.mubr.msk.bf16.vlgmr.msra.gmra.mrb[0].mxu1 %vm144_vm2, %v104_v17 }
 0x1b9   :  { %v182_v20 = vpop.f32.mrb[0].mxu1 }
 0x1ba   :  { %v183_v21 = vadd.f32 %v258_v18, %v182_v20  ;;  %v296_v22 = vpop.f32.mrb[1].mxu1 }
 0x1bb   :  { %v185_v24 = vpop.f32.mrb[2].mxu1 }
 0x1bc   :  { %v186_v25 = vadd.f32 %v258_v18, %v185_v24  ;;  %v297_v26 = vpop.f32.mrb[3].mxu1  ;;  %v191_v27 = vadd.f32 %v189_v19, %v183_v21 }
 0x1be   :  { %v195_v28 = vsel %vm57_vm1, %v191_v27, 0.0  ;;  %v192_v29 = vadd.f32 %v190_v23, %v186_v25 }
 0x1bf   :  { %196 = vadd.xlane.f32.xlu0 %v195_v28 }
 0x1c0   :  { %v198_v30 = vsel %vm57_vm1, %v192_v29, 0.0 }
 0x1c3   :  { %199 = vadd.xlane.f32.xlu0 %v198_v30 }
 0x24c   :  { %v197_v31 = vpop.xlane.xlu0 %196 }
 0x24d   :  { %v202_v32 = vmul.f32 0.03125, %v197_v31 }
 0x24f   :  { %v204_v33 = vsub.f32 %v191_v27, %v202_v32 }
 0x250   :  { %v200_v34 = vpop.xlane.xlu0 %199 }
 0x251   :  { %v203_v35 = vmul.f32 0.03125, %v200_v34  ;;  %v206_v36 = vmul.f32 %v204_v33, %v204_v33 }
 0x253   :  { %v205_v37 = vsub.f32 %v192_v29, %v203_v35  ;;  %v208_v38 = vsel %vm57_vm1, %v206_v36, 0.0 }
 0x254   :  { %209 = vadd.xlane.f32.xlu1 %v208_v38 }
 0x255   :  { %v207_v39 = vmul.f32 %v205_v37, %v205_v37 }
 0x257   :  { %v211_v40 = vsel %vm57_vm1, %v207_v39, 0.0 }
 0x258   :  { %212 = vadd.xlane.f32.xlu1 %v211_v40 }
 0x2e1   :  { %v210_v41 = vpop.xlane.xlu1 %209 }
 0x2e2   :  { %v214_v42 = vmul.f32 0.03125, %v210_v41 }
 0x2e4   :  { %v216_v43 = vadd.f32 1e-05, %v214_v42 }
 0x2e5   :  { %v213_v44 = vpop.xlane.xlu1 %212 }
 0x2e6   :  { %308 = vrsqrt.f32 %v216_v43  ;;  %v215_v45 = vmul.f32 0.03125, %v213_v44 }
 0x2e8   :  { %v217_v46 = vadd.f32 1e-05, %v215_v45 }
 0x2ea   :  { %310 = vrsqrt.f32 %v217_v46 }
 0x2f0   :  { %v309_v47 = vpop.eup %308 }
 0x2f1   :  { %v220_v49 = vmul.f32 %v309_v47, %v204_v33 }
 0x2f3   :  { %v228_v51 = vmul.f32 %v264_v48, %v220_v49 }
 0x2f4   :  { %v311_v52 = vpop.eup %310 }
 0x2f5   :  { %v236_v53 = vadd.f32 %v265_v50, %v228_v51  ;;  %v221_v54 = vmul.f32 %v311_v52, %v205_v37 }
 0x2f7   :  { %v268_v55 = vpack.c.bf16 %v236_v53, %v236_v53  ;;  %v229_v56 = vmul.f32 %v264_v48, %v221_v54 }
 0x2f9   :  { %247 = vst.msk [vmem:[%s405_s7] sm:$0xf] %vm246_vm3, %v268_v55  ;;  %v237_v57 = vadd.f32 %v265_v50, %v229_v56 }
 0x2fb   :  { %v269_v58 = vpack.c.bf16 %v237_v57, %v237_v57 }
 0x2fd   :  { %248 = vst.msk [vmem:[%s405_s7 + $0x4] sm:$0xf] %vm246_vm3, %v269_v58 }

// kernel: transformer_forward.20
= control target key start
LH: loop header
LB: loop body
LE: loop exit
PB: predicated region body
PF: predicated region fallthrough
CT: control target
= control target key end

     0   :  { %s694_s21 = smov 0   ;;  %s751_s0 = inlined_call_operand.vmem [shape: bf16[2,4,8,8], index: 0, kind: input, shape index: {}]   ;;  %s752_s1 = inlined_call_operand.vmem [shape: bf16[2,8,32], index: 1, kind: input, shape index: {}]   ;;  %s753_s2 = inlined_call_operand.vmem [shape: bf16[4,8,32], index: 2, kind: input, shape index: {}]   ;;  %s754_s3 = inlined_call_operand.vmem [shape: f32[1,32], index: 3, kind: input, shape index: {}]   ;;  %s755_s4 = inlined_call_operand.vmem [shape: f32[1,32], index: 4, kind: input, shape index: {}]   ;;  %s756_s5 = inlined_call_operand.vmem [shape: f32[1,32], index: 5, kind: input, shape index: {}]   ;;  %s757_s6 = inlined_call_operand.vmem [shape: bf16[2,8,32], index: 6, kind: output, shape index: {}]  }
   0x1 LB: > { %s580_s22 = sadd.s32 4294967295, %s655_s21   ;;  %p584_p0 = scmp.ge.s32.totalorder %s655_s21, 1  ;;  %s655_s21 = sphi %s694_s21, %s16_s21  }
   0x2   : > { %p221_p1 = scmp.lt.s32.totalorder %s655_s21, 3 }
   0x4   : > { %p222_p2 = pnand %p584_p0, %p221_p1 }
   0x5   : > { %v590_v0 = vld [vmem:[%s753_s2 + $0x4] sm:$0xf] (!%p222_p2)  ;;  %vm278_vm0 = vcmask (!%p222_p2), 1043456   ;;  %v269_v1 = vld [vmem:[%s753_s2] sm:$0xf] (!%p222_p2)  ;;  %v657_v2 = vmov (!%p222_p2), 0.0  }
   0x6   : > { %225 = sbr.rel (%p222_p2) target bundleno = 561 (0x231), region = 44  ;;  %613 = vmatprep.subr.bf16.mxu0 (!%p222_p2), %v657_v2  ;;  %v280_v3 = vsel (!%p222_p2), %vm278_vm0, %v590_v0, 0  ;;  %619 = vmatprep.subr.bf16.mxu1 (!%p222_p2), %v657_v2  ;;  %v326_v4 = vsel (!%p222_p2), %vm278_vm0, %v269_v1, 0  ;;  %p254_p3 = scmp.lt.s32.totalorder (!%p222_p2), %s580_s22, 1  ;;  %vm658_vm1 = vmmov (!%p222_p2), 0   ;;  %vm274_vm2 = vcmask (!%p222_p2), 64512  }
   0x7   : > { %614 = vmatpush3.bf16.msra.mxu0 (!%p222_p2), %v280_v3  ;;  %620 = vmatpush3.bf16.msra.mxu1 (!%p222_p2), %v326_v4  ;;  %v594_v5 = vld [vmem:[%s753_s2 + $0x8] sm:$0xf] (!%p222_p2)  ;;  %v597_v6 = vld [vmem:[%s753_s2 + $0xc] sm:$0xf] (!%p222_p2)  ;;  %v599_v34 = vld [vmem:[%s754_s3] ss:$0 sm:$0xff] (!%p222_p2) }
   0x8   : > { %615 = vmatprep.mubr.msk.bf16.mxu0 (!%p222_p2), %vm658_vm1, %v657_v2  ;;  %621 = vmatprep.mubr.msk.bf16.mxu1 (!%p222_p2), %vm658_vm1, %v657_v2  ;;  %v376_v7 = vsel (!%p222_p2), %vm278_vm0, %v594_v5, 0  ;;  %v427_v8 = vsel (!%p222_p2), %vm278_vm0, %v597_v6, 0  ;;  %vm483_vm3 = vcmask (!%p222_p2), 261120   ;;  %v600_v47 = vld [vmem:[%s755_s4] ss:$0 sm:$0xff] (!%p222_p2)  ;;  %vm513_vm4 = vcmask (!%p222_p2), 257024  }
   0x9   : > { %625 = vmatprep.subr.bf16.mxu0 (!%p222_p2), %v657_v2  ;;  %631 = vmatprep.subr.bf16.mxu1 (!%p222_p2), %v657_v2  ;;  %v601_v49 = vld [vmem:[%s756_s5] ss:$0 sm:$0xff] (!%p222_p2) }
   0xd   : > { %s759_s22 = smov (!%p254_p3, %s580_s22), 1 }
   0xe   : > { %s604_s7 = sshll.u32 %s759_s22, 4  ;;  %s587_s11 = sshll.u32 %s759_s22, 2 }
   0xf   : > { %s258_s10 = scalar_lea.vmem %s751_s0, %s604_s7  ;;  %s262_s14 = scalar_lea.vmem %s752_s1, %s587_s11 }
  0x10   : > { %v589_v9 = vld [vmem:[%s258_s10 + $0x4] sm:$0xf]  ;;  %v268_v10 = vld [vmem:[%s258_s10] sm:$0xf]  ;;  %v593_v11 = vld [vmem:[%s258_s10 + $0x8] sm:$0xf]  ;;  %s266_s25 = scalar_lea.vmem %s757_s6, %s587_s11 }
  0x11   : > { %616 = vmatmul.mubr.msk.bf16.vlgmr.msra.gmra.mrb[0].mxu0 %vm274_vm2, %v589_v9  ;;  %622 = vmatmul.mubr.msk.bf16.vlgmr.msra.gmra.mrb[0].mxu1 %vm274_vm2, %v268_v10  ;;  %v596_v12 = vld [vmem:[%s258_s10 + $0xc] sm:$0xf]  ;;  %v470_v22 = vld [vmem:[%s262_s14] sm:$0xf] }
  0x12   : > { %626 = vmatpush3.bf16.msra.mxu0 %v376_v7  ;;  %632 = vmatpush3.bf16.msra.mxu1 %v427_v8  ;;  %v471_v26 = vunpack.c.l.bf16 %v470_v22 }
  0x13   : > { %627 = vmatprep.mubr.msk.bf16.mxu0 %vm658_vm1, %v657_v2  ;;  %633 = vmatprep.mubr.msk.bf16.mxu1 %vm658_vm1, %v657_v2 }
  0x19   : > { %628 = vmatmul.mubr.msk.bf16.vlgmr.msra.gmra.mrb[4].mxu0 %vm274_vm2, %v593_v11  ;;  %634 = vmatmul.mubr.msk.bf16.vlgmr.msra.gmra.mrb[4].mxu1 %vm274_vm2, %v596_v12 }
  0xe4   : > { %v316_v13 = vpop.f32.mrb[0].mxu0  ;;  %v362_v14 = vpop.f32.mrb[0].mxu1 }
  0xe5   : > { %v363_v15 = vadd.f32 %v362_v14, %v316_v13  ;;  %v617_v16 = vpop.f32.mrb[1].mxu0  ;;  %v623_v17 = vpop.f32.mrb[1].mxu1 }
  0xe6   : > { %v319_v18 = vpop.f32.mrb[2].mxu0  ;;  %v365_v19 = vpop.f32.mrb[2].mxu1 }
  0xe7   : > { %v618_v20 = vpop.f32.mrb[3].mxu0  ;;  %v624_v21 = vpop.f32.mrb[3].mxu1 }
  0xec   : > { %v412_v23 = vpop.f32.mrb[4].mxu0  ;;  %v463_v24 = vpop.f32.mrb[4].mxu1 }
  0xed   : > { %v418_v25 = vadd.f32 %v412_v23, %v363_v15  ;;  %v629_v27 = vpop.f32.mrb[5].mxu0  ;;  %v635_v28 = vpop.f32.mrb[5].mxu1 }
  0xee   : > { %v415_v29 = vpop.f32.mrb[6].mxu0  ;;  %v466_v30 = vpop.f32.mrb[6].mxu1 }
  0xef   : > { %v469_v31 = vadd.f32 %v463_v24, %v418_v25  ;;  %v630_v32 = vpop.f32.mrb[7].mxu0  ;;  %v636_v33 = vpop.f32.mrb[7].mxu1 }
  0xf1   : > { %v472_v35 = vadd.f32 %v471_v26, %v469_v31 }
  0xf3   : > { %v480_v36 = vadd.f32 %v599_v34, %v472_v35 }
  0xf5   : > { %v484_v37 = vsel %vm483_vm3, %v480_v36, 0.0 }
  0xf6   : > { %485 = vadd.xlane.f32.xlu0 %v484_v37 }
 0x183   : > { %v486_v38 = vpop.xlane.xlu0 %485 }
 0x184   : > { %v488_v39 = vmul.f32 0.03125, %v486_v38 }
 0x186   : > { %v489_v40 = vsub.f32 %v480_v36, %v488_v39 }
 0x188   : > { %v490_v41 = vmul.f32 %v489_v40, %v489_v40 }
 0x18a   : > { %v491_v42 = vsel %vm483_vm3, %v490_v41, 0.0 }
 0x18b   : > { %492 = vadd.xlane.f32.xlu0 %v491_v42 }
 0x218   : > { %v493_v43 = vpop.xlane.xlu0 %492 }
 0x219   : > { %v494_v44 = vmul.f32 0.03125, %v493_v43 }
 0x21b   : > { %v495_v45 = vadd.f32 1e-05, %v494_v44 }
 0x21d   : > { %647 = vrsqrt.f32 %v495_v45 }
 0x227   : > { %v648_v46 = vpop.eup %647 }
 0x228   : > { %v497_v48 = vmul.f32 %v648_v46, %v489_v40 }
 0x22a   : > { %v504_v50 = vmul.f32 %v600_v47, %v497_v48 }
 0x22c   : > { %v511_v51 = vadd.f32 %v601_v49, %v504_v50 }
 0x22e   : > { %v512_v52 = vpack.c.bf16 %v511_v51, %v511_v51 }
 0x230   : > { %514 = vst.msk [vmem:[%s266_s25] sm:$0xf] %vm513_vm4, %v512_v52 }
 0x231 PF: > { %s16_s21 = sadd.s32 1, %s655_s21  }
 0x232   : > { %p13_p4 = scmp.ge.s32.totalorder %s16_s21, 4  }
 0x234   :  { %15 = sbr.rel (!%p13_p4) target bundleno = 1 (0x1), region = 83 }

// kernel: transformer_forward.19
= control target key start
LH: loop header
LB: loop body
LE: loop exit
PB: predicated region body
PF: predicated region fallthrough
CT: control target
= control target key end

     0   :  { %s1099_s27 = smov 0   ;;  %s1101_s28 = smov 0   ;;  %s1202_s0 = inlined_call_operand.vmem [shape: bf16[2,8,32], index: 0, kind: input, shape index: {}]   ;;  %s1203_s1 = inlined_call_operand.vmem [shape: bf16[4,32,8], index: 1, kind: input, shape index: {}]   ;;  %s1204_s2 = inlined_call_operand.vmem [shape: bf16[4,32,8], index: 2, kind: input, shape index: {}]   ;;  %s1205_s3 = inlined_call_operand.vmem [shape: bf16[4,32,8], index: 3, kind: input, shape index: {}]   ;;  %s1206_s4 = inlined_call_operand.vmem [shape: f32[4,1,8], index: 4, kind: input, shape index: {}]   ;;  %s1207_s5 = inlined_call_operand.vmem [shape: f32[4,1,8], index: 5, kind: input, shape index: {}]   ;;  %s1208_s6 = inlined_call_operand.vmem [shape: f32[4,1,8], index: 6, kind: input, shape index: {}]   ;;  %s1209_s7 = inlined_call_operand.vmem [shape: f32[8,8], index: 7, kind: input, shape index: {}]   ;;  %s1210_s8 = inlined_call_operand.vmem [shape: bf16[2,4,8,8], index: 8, kind: output, shape index: {}]  }
   0x1   :  { %s1103_s29 = smov 0   ;;  %s1105_s30 = smov 0  }
   0x2   :  { %s1107_s9 = smov 0  }
   0x3 LB: > { %s27_s10 = sadd.s32 1, %s1042_s29  ;;  %s30_s11 = sadd.s32 1, %s1046_s30  ;;  %s1050_s9 = sphi %s1107_s9, %s18_s9   ;;  %s1046_s30 = sphi %s1105_s30, %s1214_s30   ;;  %s1042_s29 = sphi %s1103_s29, %s1213_s29   ;;  %s1038_s28 = sphi %s1101_s28, %s1212_s28   ;;  %s1034_s27 = sphi %s1099_s27, %s1211_s27  }
   0x4   : > { %p28_p0 = scmp.ge.s32.totalorder %s27_s10, 4  ;;  %p882_p1 = scmp.ge.s32.totalorder %s1050_s9, 1 }
   0x5   : > { %p329_p2 = scmp.lt.s32.totalorder %s1050_s9, 9 }
   0x6   : > { %s1216_s10 = smov (%p28_p0, %s27_s10), 0  ;;  %s1218_s11 = smov (!%p28_p0, %s30_s11), %s1046_s30 }
   0x7   : > { %p330_p3 = pnand %p882_p1, %p329_p2  ;;  %p32_p4 = scmp.ge.s32.totalorder %s1218_s11, 2 }
   0x8   : > { %p393_p5 = scmp.lt.s32.totalorder (!%p330_p3), %s1034_s27, 3  ;;  %p389_p6 = scmp.lt.s32.totalorder (!%p330_p3), %s1038_s28, 1  ;;  %v1052_v0 = vmov (!%p330_p3), 0.0   ;;  %vm1053_vm0 = vmmov (!%p330_p3), 0   ;;  %vm451_vm1 = vcmask (!%p330_p3), 261120   ;;  %vm623_vm2 = vcmask (!%p330_p3), 64512  }
   0x9   : > { %s1220_s11 = smov (%p32_p4, %s1218_s11), 0  ;;  %333 = sbr.rel (%p330_p3) target bundleno = 998 (0x3e6), region = 52 }
   0xa   : > { %932 = vmatprep.subr.bf16.mxu1 (!%p330_p3), %v1052_v0  ;;  %924 = vmatprep.subr.bf16.mxu0 (!%p330_p3), %v1052_v0  ;;  %v426_v24 = vld [vmem:[%s1209_s7] sm:$0xff] (!%p330_p3)  ;;  %vm688_vm3 = vcmask (!%p330_p3), 1043456   ;;  %vm733_vm4 = vcmask (!%p330_p3), 60416  }
   0xb   : > { %936 = vmatprep.mubr.msk.bf16.mxu1 (!%p330_p3), %vm1053_vm0, %v1052_v0  ;;  %928 = vmatprep.mubr.msk.bf16.mxu0 (!%p330_p3), %vm1053_vm0, %v1052_v0 }
  0x10   : > { %s1222_s27 = smov (!%p393_p5, %s1034_s27), 3  ;;  %s1224_s28 = smov (!%p389_p6, %s1038_s28), 1 }
  0x11   : > { %s908_s12 = sshll.u32 %s1222_s27, 4  ;;  %s883_s19 = sshll.u32 %s1224_s28, 2 }
  0x12   : > { %s402_s15 = scalar_lea.vmem %s1204_s2, %s908_s12  ;;  %s397_s18 = scalar_lea.vmem %s1203_s1, %s908_s12 }
  0x13   : > { %v1002_v1 = vld [vmem:[%s402_s15] sm:$0xff]   ;;  %v1003_v2 = vld [vmem:[%s402_s15 + $0x8] sm:$0xff]   ;;  %s1146_s22 = scalar_lea.vmem %s1205_s3, %s908_s12  ;;  %s392_s25 = scalar_lea.vmem %s1202_s0, %s883_s19 }
  0x14   : > { %933 = vmatpush3.bf16.msra.mxu1 %v1002_v1  ;;  %v1004_v3 = vld [vmem:[%s397_s18] sm:$0xff]   ;;  %v1005_v4 = vld [vmem:[%s397_s18 + $0x8] sm:$0xff]   ;;  %s413_s13 = scalar_lea.vmem %s1207_s5, %s1222_s27  ;;  %s410_s16 = scalar_lea.vmem %s1206_s4, %s1222_s27 }
  0x15   : > { %934 = vmatprep.subr.bf16.mxu1 %v1052_v0  ;;  %925 = vmatpush3.bf16.msra.mxu0 %v1004_v3  ;;  %v427_v5 = vld [vmem:[%s392_s25] sm:$0xf]  ;;  %v1007_v22 = vld [vmem:[%s1146_s22 + $0x8] sm:$0xff]   ;;  %s422_s23 = sadd.s32 %s883_s19, %s1222_s27 }
  0x16   : > { %926 = vmatprep.subr.bf16.mxu0 %v1052_v0  ;;  %v896_v6 = vld [vmem:[%s413_s13] ss:$0 sm:$0xff]  ;;  %s891_s24 = sshll.u32 %s422_s23, 2 }
  0x17   : > { %v892_v11 = vld [vmem:[%s410_s16] ss:$0 sm:$0xff]  ;;  %s424_s12 = scalar_lea.vmem %s1210_s8, %s891_s24 }
  0x18   : > { %935 = vmatpush3.bf16.msra.mxu1 %v1003_v2  ;;  %v1006_v21 = vld [vmem:[%s1146_s22] sm:$0xff]   ;;  %s416_s22 = scalar_lea.vmem %s1208_s6, %s1222_s27 }
  0x19   : > { %948 = vmatprep.subr.bf16.mxu1 %v1052_v0  ;;  %927 = vmatpush3.bf16.msra.mxu0 %v1005_v4  ;;  %v900_v39 = vld [vmem:[%s416_s22] ss:$0 sm:$0xff] }
  0x1a   : > { %940 = vmatprep.subr.bf16.mxu0 %v1052_v0 }
  0x1b   : > { %937 = vmatmul.mubr.msk.bf16.vlgmr.msra.gmra.mrb[0].mxu1 %vm451_vm1, %v427_v5 }
  0x1c   : > { %950 = vmatprep.mubr.msk.bf16.mxu1 %vm1053_vm0, %v1052_v0  ;;  %929 = vmatmul.mubr.msk.bf16.vlgmr.msra.gmra.mrb[0].mxu0 %vm451_vm1, %v427_v5 }
  0x1d   : > { %944 = vmatprep.mubr.msk.bf16.mxu0 %vm1053_vm0, %v1052_v0  ;;  %941 = vmatpush3.bf16.msra.mxu0 %v1006_v21 }
  0x1e   : > { %942 = vmatprep.subr.bf16.mxu0 %v1052_v0 }
  0x21   : > { %943 = vmatpush3.bf16.msra.mxu0 %v1007_v22 }
  0x22   : > { %954 = vmatprep.subr.bf16.mxu0 %v1052_v0 }
  0x24   : > { %945 = vmatmul.mubr.msk.bf16.vlgmr.msra.gmra.mrb[4].mxu0 %vm451_vm1, %v427_v5 }
  0x25   : > { %956 = vmatprep.mubr.msk.bf16.mxu0 %vm1053_vm0, %v1052_v0 }
  0xee   : > { %v552_v7 = vpop.f32.mrb[0].mxu1 }
  0xef   : > { %v553_v8 = vadd.f32 %v896_v6, %v552_v7  ;;  %v938_v9 = vpop.f32.mrb[1].mxu1  ;;  %v489_v12 = vpop.f32.mrb[0].mxu0 }
  0xf0   : > { %v555_v10 = vpop.f32.mrb[2].mxu1  ;;  %v930_v15 = vpop.f32.mrb[1].mxu0  ;;  %v490_v18 = vadd.f32 %v892_v11, %v489_v12 }
  0xf1   : > { %v622_v13 = vpack.c.bf16 %v553_v8, %v553_v8  ;;  %v939_v14 = vpop.f32.mrb[3].mxu1  ;;  %v492_v16 = vpop.f32.mrb[2].mxu0 }
  0xf2   : > { %v931_v19 = vpop.f32.mrb[3].mxu0  ;;  %v621_v20 = vpack.c.bf16 %v490_v18, %v490_v18 }
  0xf3   : > { %v628_v17 = vsel %vm623_vm2, %v622_v13, 0 }
  0xf4   : > { %949 = vmatpush3.bf16.xpose.msra.mxu1 %v628_v17 }
  0xf7   : > { %v615_v36 = vpop.f32.mrb[4].mxu0 }
  0xf8   : > { %v946_v37 = vpop.f32.mrb[5].mxu0  ;;  %v616_v41 = vadd.f32 %v900_v39, %v615_v36 }
  0xf9   : > { %v618_v38 = vpop.f32.mrb[6].mxu0 }
  0xfa   : > { %v947_v40 = vpop.f32.mrb[7].mxu0  ;;  %v684_v42 = vpack.c.bf16 %v616_v41, %v616_v41 }
  0xfb   : > { %951 = vmatmul.mubr.msk.bf16.vlgmr.msra.gmra.mrb[4].mxu1 %vm623_vm2, %v621_v20 }
  0xfc   : > { %v690_v43 = vsel %vm688_vm3, %v684_v42, 0 }
  0xfd   : > { %955 = vmatpush3.bf16.msra.mxu0 %v690_v43 }
 0x1ce   : > { %v664_v23 = vpop.f32.mrb[4].mxu1 }
 0x1cf   : > { %v670_v25 = vmul.f32 0.35355338, %v664_v23  ;;  %v952_v26 = vpop.f32.mrb[5].mxu1 }
 0x1d0   : > { %v667_v27 = vpop.f32.mrb[6].mxu1 }
 0x1d1   : > { %v953_v28 = vpop.f32.mrb[7].mxu1  ;;  %v671_v29 = vadd.f32 %v670_v25, %v426_v24 }
 0x1d3   : > { %v672_v30 = vsel %vm623_vm2, %v671_v29, -inf }
 0x1d4   : > { %673 = vmax.xlane.f32.xlu0 %v672_v30 }
 0x261   : > { %v674_v31 = vpop.xlane.xlu0 %673 }
 0x262   : > { %v675_v32 = vsub.f32 %v671_v29, %v674_v31 }
 0x264   : > { %v676_v33 = vmul.f32 1.442695, %v675_v32 }
 0x266   : > { %1008 = vpow2.f32 %v676_v33 }
 0x270   : > { %v1009_v34 = vpop.eup %1008 }
 0x271   : > { %v678_v35 = vsel %vm623_vm2, %v1009_v34, 0.0 }
 0x272   : > { %679 = vadd.xlane.f32.xlu0 %v678_v35 }
 0x2ff   : > { %v680_v44 = vpop.xlane.xlu0 %679 }
 0x300   : > { %1010 = vrcp.f32 %v680_v44 }
 0x30a   : > { %v1011_v45 = vpop.eup %1010 }
 0x30b   : > { %v682_v46 = vmul.f32 %v1011_v45, %v1009_v34 }
 0x30d   : > { %v683_v47 = vpack.c.bf16 %v682_v46, %v682_v46 }
 0x30f   : > { %957 = vmatmul.mubr.msk.bf16.vlgmr.msra.gmra.mrb[8].mxu0 %vm623_vm2, %v683_v47 }
 0x3e2   : > { %v726_v48 = vpop.f32.mrb[8].mxu0 }
 0x3e3   : > { %v732_v49 = vpack.c.bf16 %v726_v48, %v726_v48  ;;  %v958_v50 = vpop.f32.mrb[9].mxu0 }
 0x3e4   : > { %v729_v51 = vpop.f32.mrb[10].mxu0 }
 0x3e5   : > { %734 = vst.msk [vmem:[%s424_s12] sm:$0xf] %vm733_vm4, %v732_v49  ;;  %v959_v52 = vpop.f32.mrb[11].mxu0 }
 0x3e6 PF: > { %s18_s9 = sadd.s32 1, %s1050_s9   ;;  %s1211_s27 = smov %s1042_s29 }
 0x3e7   : > { %p15_p7 = scmp.ge.s32.totalorder %s18_s9, 10   ;;  %s1212_s28 = smov %s1046_s30 }
 0x3e8   : > { %s1213_s29 = smov %s1216_s10  ;;  %s1214_s30 = smov %s1220_s11 }
 0x3e9   :  { %17 = sbr.rel (!%p15_p7) target bundleno = 3 (0x3), region = 100 }

// kernel: transformer_forward.37
= control target key start
LH: loop header
LB: loop body
LE: loop exit
PB: predicated region body
PF: predicated region fallthrough
CT: control target
= control target key end

     0   :  { %v118_v0 = vmov 0.0   ;;  %vm119_vm0 = vmmov 0   ;;  %vm45_vm1 = vcmask 261120   ;;  %vm90_vm2 = vcmask 130048   ;;  %s158_s1 = inlined_call_operand.vmem [shape: bf16[32,16], index: 1, kind: input, shape index: {}]   ;;  %s159_s0 = inlined_call_operand.vmem [shape: bf16[16,32], index: 0, kind: input, shape index: {}]   ;;  %s160_s2 = inlined_call_operand.vmem [shape: f32[1,16], index: 2, kind: input, shape index: {}]   ;;  %s161_s3 = inlined_call_operand.vmem [shape: f32[16,16], index: 3, kind: output, shape index: {}]  }
   0x1   :  { %105 = vmatprep.subr.bf16.mxu0 %v118_v0  ;;  %v115_v1 = vld [vmem:[%s158_s1] sm:$0xff]   ;;  %109 = vmatprep.mubr.msk.bf16.mxu0 %vm119_vm0, %v118_v0  ;;  %v116_v2 = vld [vmem:[%s158_s1 + $0x8] sm:$0xff]  }
   0x2   :  { %106 = vmatpush3.bf16.msra.mxu0 %v115_v1  ;;  %v117_v3 = vld [vmem:[%s159_s0] sm:$0xff]  }
   0x3   :  { %107 = vmatprep.subr.bf16.mxu0 %v118_v0  ;;  %v97_v4 = vld [vmem:[%s160_s2] ss:$0 sm:$0xff] }
   0x6   :  { %108 = vmatpush3.bf16.msra.mxu0 %v116_v2 }
   0x9   :  { %110 = vmatmul.mubr.msk.bf16.vlgmr.msra.gmra.mrb[0].mxu0 %vm45_vm1, %v117_v3 }
  0xdc   :  { %v83_v5 = vpop.f32.mrb[0].mxu0 }
  0xdd   :  { %v84_v6 = vadd.f32 %v97_v4, %v83_v5  ;;  %v111_v7 = vpop.f32.mrb[1].mxu0 }
  0xde   :  { %v86_v8 = vpop.f32.mrb[2].mxu0 }
  0xdf   :  { %91 = vst.msk [vmem:[%s161_s3] sm:$0xff] %vm90_vm2, %v84_v6  ;;  %v87_v9 = vadd.f32 %v97_v4, %v86_v8  ;;  %v112_v10 = vpop.f32.mrb[3].mxu0 }
  0xe1   :  { %92 = vst.msk [vmem:[%s161_s3 + $0x8] sm:$0xff] %vm90_vm2, %v87_v9 }

// kernel: transformer_forward.26
= control target key start
LH: loop header
LB: loop body
LE: loop exit
PB: predicated region body
PF: predicated region fallthrough
CT: control target
= control target key end

     0   :  { %s1065_s24 = smov 0   ;;  %s1067_s25 = smov 0   ;;  %s1165_s0 = inlined_call_operand.vmem [shape: bf16[2,8,32], index: 0, kind: input, shape index: {}]   ;;  %s1166_s1 = inlined_call_operand.vmem [shape: bf16[4,32,8], index: 1, kind: input, shape index: {}]   ;;  %s1167_s2 = inlined_call_operand.vmem [shape: bf16[4,32,8], index: 2, kind: input, shape index: {}]   ;;  %s1168_s3 = inlined_call_operand.vmem [shape: bf16[4,32,8], index: 3, kind: input, shape index: {}]   ;;  %s1169_s4 = inlined_call_operand.vmem [shape: f32[4,1,8], index: 4, kind: input, shape index: {}]   ;;  %s1170_s5 = inlined_call_operand.vmem [shape: f32[4,1,8], index: 5, kind: input, shape index: {}]   ;;  %s1171_s6 = inlined_call_operand.vmem [shape: f32[4,1,8], index: 6, kind: input, shape index: {}]   ;;  %s1172_s7 = inlined_call_operand.vmem [shape: bf16[2,4,8,8], index: 7, kind: output, shape index: {}]  }
   0x1   :  { %s1069_s26 = smov 0   ;;  %s1071_s27 = smov 0  }
   0x2   :  { %s1073_s28 = smov 0  }
   0x3 LB: > { %s26_s29 = sadd.s32 1, %s1013_s26  ;;  %s29_s30 = sadd.s32 1, %s1017_s27  ;;  %s1021_s28 = sphi %s1073_s28, %s17_s28   ;;  %s1017_s27 = sphi %s1071_s27, %s1176_s27   ;;  %s1013_s26 = sphi %s1069_s26, %s1175_s26   ;;  %s1009_s25 = sphi %s1067_s25, %s1174_s25   ;;  %s1005_s24 = sphi %s1065_s24, %s1173_s24  }
   0x4   : > { %p27_p0 = scmp.ge.s32.totalorder %s26_s29, 4  ;;  %p853_p1 = scmp.ge.s32.totalorder %s1021_s28, 1 }
   0x5   : > { %p304_p2 = scmp.lt.s32.totalorder %s1021_s28, 9 }
   0x6   : > { %s1178_s29 = smov (%p27_p0, %s26_s29), 0  ;;  %s1180_s30 = smov (!%p27_p0, %s29_s30), %s1017_s27 }
   0x7   : > { %p305_p3 = pnand %p853_p1, %p304_p2  ;;  %p31_p4 = scmp.ge.s32.totalorder %s1180_s30, 2 }
   0x8   : > { %p366_p5 = scmp.lt.s32.totalorder (!%p305_p3), %s1005_s24, 3  ;;  %p362_p6 = scmp.lt.s32.totalorder (!%p305_p3), %s1009_s25, 1  ;;  %v1023_v0 = vmov (!%p305_p3), 0.0   ;;  %vm1024_vm0 = vmmov (!%p305_p3), 0   ;;  %vm423_vm1 = vcmask (!%p305_p3), 261120   ;;  %vm595_vm2 = vcmask (!%p305_p3), 64512  }
   0x9   : > { %s1182_s30 = smov (%p31_p4, %s1180_s30), 0  ;;  %308 = sbr.rel (%p305_p3) target bundleno = 996 (0x3e4), region = 48 }
   0xa   : > { %903 = vmatprep.subr.bf16.mxu1 (!%p305_p3), %v1023_v0  ;;  %895 = vmatprep.subr.bf16.mxu0 (!%p305_p3), %v1023_v0  ;;  %vm659_vm3 = vcmask (!%p305_p3), 1043456   ;;  %vm704_vm4 = vcmask (!%p305_p3), 60416  }
   0xb   : > { %907 = vmatprep.mubr.msk.bf16.mxu1 (!%p305_p3), %vm1024_vm0, %v1023_v0  ;;  %899 = vmatprep.mubr.msk.bf16.mxu0 (!%p305_p3), %vm1024_vm0, %v1023_v0 }
  0x10   : > { %s1184_s24 = smov (!%p366_p5, %s1005_s24), 3  ;;  %s1186_s25 = smov (!%p362_p6, %s1009_s25), 1 }
  0x11   : > { %s879_s8 = sshll.u32 %s1184_s24, 4  ;;  %s854_s15 = sshll.u32 %s1186_s25, 2 }
  0x12   : > { %s375_s11 = scalar_lea.vmem %s1167_s2, %s879_s8  ;;  %s370_s14 = scalar_lea.vmem %s1166_s1, %s879_s8 }
  0x13   : > { %v973_v1 = vld [vmem:[%s375_s11] sm:$0xff]   ;;  %v974_v2 = vld [vmem:[%s375_s11 + $0x8] sm:$0xff]   ;;  %s1112_s18 = scalar_lea.vmem %s1168_s3, %s879_s8  ;;  %s365_s21 = scalar_lea.vmem %s1165_s0, %s854_s15 }
  0x14   : > { %904 = vmatpush3.bf16.msra.mxu1 %v973_v1  ;;  %v975_v3 = vld [vmem:[%s370_s14] sm:$0xff]   ;;  %v976_v4 = vld [vmem:[%s370_s14 + $0x8] sm:$0xff]   ;;  %s386_s8 = scalar_lea.vmem %s1170_s5, %s1184_s24  ;;  %s383_s11 = scalar_lea.vmem %s1169_s4, %s1184_s24 }
  0x15   : > { %905 = vmatprep.subr.bf16.mxu1 %v1023_v0  ;;  %896 = vmatpush3.bf16.msra.mxu0 %v975_v3  ;;  %v399_v5 = vld [vmem:[%s365_s21] sm:$0xf]  ;;  %v978_v22 = vld [vmem:[%s1112_s18 + $0x8] sm:$0xff]   ;;  %s389_s14 = scalar_lea.vmem %s1171_s6, %s1184_s24  ;;  %s395_s16 = sadd.s32 %s854_s15, %s1184_s24 }
  0x16   : > { %897 = vmatprep.subr.bf16.mxu0 %v1023_v0  ;;  %v867_v6 = vld [vmem:[%s386_s8] ss:$0 sm:$0xff]  ;;  %s862_s17 = sshll.u32 %s395_s16, 2 }
  0x17   : > { %v863_v11 = vld [vmem:[%s383_s11] ss:$0 sm:$0xff]  ;;  %s397_s20 = scalar_lea.vmem %s1172_s7, %s862_s17 }
  0x18   : > { %906 = vmatpush3.bf16.msra.mxu1 %v974_v2  ;;  %v977_v21 = vld [vmem:[%s1112_s18] sm:$0xff]  }
  0x19   : > { %919 = vmatprep.subr.bf16.mxu1 %v1023_v0  ;;  %898 = vmatpush3.bf16.msra.mxu0 %v976_v4  ;;  %v871_v37 = vld [vmem:[%s389_s14] ss:$0 sm:$0xff] }
  0x1a   : > { %911 = vmatprep.subr.bf16.mxu0 %v1023_v0 }
  0x1b   : > { %908 = vmatmul.mubr.msk.bf16.vlgmr.msra.gmra.mrb[0].mxu1 %vm423_vm1, %v399_v5 }
  0x1c   : > { %921 = vmatprep.mubr.msk.bf16.mxu1 %vm1024_vm0, %v1023_v0  ;;  %900 = vmatmul.mubr.msk.bf16.vlgmr.msra.gmra.mrb[0].mxu0 %vm423_vm1, %v399_v5 }
  0x1d   : > { %915 = vmatprep.mubr.msk.bf16.mxu0 %vm1024_vm0, %v1023_v0  ;;  %912 = vmatpush3.bf16.msra.mxu0 %v977_v21 }
  0x1e   : > { %913 = vmatprep.subr.bf16.mxu0 %v1023_v0 }
  0x21   : > { %914 = vmatpush3.bf16.msra.mxu0 %v978_v22 }
  0x22   : > { %925 = vmatprep.subr.bf16.mxu0 %v1023_v0 }
  0x24   : > { %916 = vmatmul.mubr.msk.bf16.vlgmr.msra.gmra.mrb[4].mxu0 %vm423_vm1, %v399_v5 }
  0x25   : > { %927 = vmatprep.mubr.msk.bf16.mxu0 %vm1024_vm0, %v1023_v0 }
  0xee   : > { %v524_v7 = vpop.f32.mrb[0].mxu1 }
  0xef   : > { %v525_v8 = vadd.f32 %v867_v6, %v524_v7  ;;  %v909_v9 = vpop.f32.mrb[1].mxu1  ;;  %v461_v12 = vpop.f32.mrb[0].mxu0 }
  0xf0   : > { %v527_v10 = vpop.f32.mrb[2].mxu1  ;;  %v901_v15 = vpop.f32.mrb[1].mxu0  ;;  %v462_v18 = vadd.f32 %v863_v11, %v461_v12 }
  0xf1   : > { %v594_v13 = vpack.c.bf16 %v525_v8, %v525_v8  ;;  %v910_v14 = vpop.f32.mrb[3].mxu1  ;;  %v464_v16 = vpop.f32.mrb[2].mxu0 }
  0xf2   : > { %v902_v19 = vpop.f32.mrb[3].mxu0  ;;  %v593_v20 = vpack.c.bf16 %v462_v18, %v462_v18 }
  0xf3   : > { %v600_v17 = vsel %vm595_vm2, %v594_v13, 0 }
  0xf4   : > { %920 = vmatpush3.bf16.xpose.msra.mxu1 %v600_v17 }
  0xf7   : > { %v587_v34 = vpop.f32.mrb[4].mxu0 }
  0xf8   : > { %v917_v35 = vpop.f32.mrb[5].mxu0  ;;  %v588_v39 = vadd.f32 %v871_v37, %v587_v34 }
  0xf9   : > { %v590_v36 = vpop.f32.mrb[6].mxu0 }
  0xfa   : > { %v918_v38 = vpop.f32.mrb[7].mxu0  ;;  %v655_v40 = vpack.c.bf16 %v588_v39, %v588_v39 }
  0xfb   : > { %922 = vmatmul.mubr.msk.bf16.vlgmr.msra.gmra.mrb[4].mxu1 %vm595_vm2, %v593_v20 }
  0xfc   : > { %v661_v41 = vsel %vm659_vm3, %v655_v40, 0 }
  0xfd   : > { %926 = vmatpush3.bf16.msra.mxu0 %v661_v41 }
 0x1ce   : > { %v636_v23 = vpop.f32.mrb[4].mxu1 }
 0x1cf   : > { %v642_v24 = vmul.f32 0.35355338, %v636_v23  ;;  %v923_v25 = vpop.f32.mrb[5].mxu1 }
 0x1d0   : > { %v639_v26 = vpop.f32.mrb[6].mxu1 }
 0x1d1   : > { %v924_v27 = vpop.f32.mrb[7].mxu1  ;;  %v643_v28 = vsel %vm595_vm2, %v642_v24, -inf }
 0x1d2   : > { %644 = vmax.xlane.f32.xlu0 %v643_v28 }
 0x25f   : > { %v645_v29 = vpop.xlane.xlu0 %644 }
 0x260   : > { %v646_v30 = vsub.f32 %v642_v24, %v645_v29 }
 0x262   : > { %v647_v31 = vmul.f32 1.442695, %v646_v30 }
 0x264   : > { %979 = vpow2.f32 %v647_v31 }
 0x26e   : > { %v980_v32 = vpop.eup %979 }
 0x26f   : > { %v649_v33 = vsel %vm595_vm2, %v980_v32, 0.0 }
 0x270   : > { %650 = vadd.xlane.f32.xlu0 %v649_v33 }
 0x2fd   : > { %v651_v42 = vpop.xlane.xlu0 %650 }
 0x2fe   : > { %981 = vrcp.f32 %v651_v42 }
 0x308   : > { %v982_v43 = vpop.eup %981 }
 0x309   : > { %v653_v44 = vmul.f32 %v982_v43, %v980_v32 }
 0x30b   : > { %v654_v45 = vpack.c.bf16 %v653_v44, %v653_v44 }
 0x30d   : > { %928 = vmatmul.mubr.msk.bf16.vlgmr.msra.gmra.mrb[8].mxu0 %vm595_vm2, %v654_v45 }
 0x3e0   : > { %v697_v46 = vpop.f32.mrb[8].mxu0 }
 0x3e1   : > { %v703_v47 = vpack.c.bf16 %v697_v46, %v697_v46  ;;  %v929_v48 = vpop.f32.mrb[9].mxu0 }
 0x3e2   : > { %v700_v49 = vpop.f32.mrb[10].mxu0 }
 0x3e3   : > { %705 = vst.msk [vmem:[%s397_s20] sm:$0xf] %vm704_vm4, %v703_v47  ;;  %v930_v50 = vpop.f32.mrb[11].mxu0 }
 0x3e4 PF: > { %s17_s28 = sadd.s32 1, %s1021_s28   ;;  %s1173_s24 = smov %s1013_s26 }
 0x3e5   : > { %p14_p7 = scmp.ge.s32.totalorder %s17_s28, 10   ;;  %s1174_s25 = smov %s1017_s27 }
 0x3e6   : > { %s1175_s26 = smov %s1178_s29  ;;  %s1176_s27 = smov %s1182_s30 }
 0x3e7   :  { %16 = sbr.rel (!%p14_p7) target bundleno = 3 (0x3), region = 96 }

// kernel: transformer_forward.28
= control target key start
LH: loop header
LB: loop body
LE: loop exit
PB: predicated region body
PF: predicated region fallthrough
CT: control target
= control target key end

     0   :  { %s1131_s27 = smov 0   ;;  %s1133_s28 = smov 0   ;;  %s1232_s0 = inlined_call_operand.vmem [shape: bf16[2,8,32], index: 0, kind: input, shape index: {}]   ;;  %s1233_s1 = inlined_call_operand.vmem [shape: bf16[2,8,32], index: 1, kind: input, shape index: {}]   ;;  %s1234_s2 = inlined_call_operand.vmem [shape: bf16[4,32,8], index: 2, kind: input, shape index: {}]   ;;  %s1235_s3 = inlined_call_operand.vmem [shape: bf16[4,32,8], index: 3, kind: input, shape index: {}]   ;;  %s1236_s4 = inlined_call_operand.vmem [shape: bf16[4,32,8], index: 4, kind: input, shape index: {}]   ;;  %s1237_s5 = inlined_call_operand.vmem [shape: f32[4,1,8], index: 5, kind: input, shape index: {}]   ;;  %s1238_s6 = inlined_call_operand.vmem [shape: f32[4,1,8], index: 6, kind: input, shape index: {}]   ;;  %s1239_s7 = inlined_call_operand.vmem [shape: f32[4,1,8], index: 7, kind: input, shape index: {}]   ;;  %s1240_s8 = inlined_call_operand.vmem [shape: bf16[2,4,8,8], index: 8, kind: output, shape index: {}]  }
   0x1   :  { %s1135_s29 = smov 0   ;;  %s1137_s30 = smov 0  }
   0x2   :  { %s1139_s9 = smov 0  }
   0x3 LB: > { %s27_s10 = sadd.s32 1, %s1074_s29  ;;  %s30_s11 = sadd.s32 1, %s1078_s30  ;;  %s1082_s9 = sphi %s1139_s9, %s18_s9   ;;  %s1078_s30 = sphi %s1137_s30, %s1244_s30   ;;  %s1074_s29 = sphi %s1135_s29, %s1243_s29   ;;  %s1070_s28 = sphi %s1133_s28, %s1242_s28   ;;  %s1066_s27 = sphi %s1131_s27, %s1241_s27  }
   0x4   : > { %p28_p0 = scmp.ge.s32.totalorder %s27_s10, 4  ;;  %p913_p1 = scmp.ge.s32.totalorder %s1082_s9, 1 }
   0x5   : > { %p338_p2 = scmp.lt.s32.totalorder %s1082_s9, 9 }
   0x6   : > { %s1246_s10 = smov (%p28_p0, %s27_s10), 0  ;;  %s1248_s11 = smov (!%p28_p0, %s30_s11), %s1078_s30 }
   0x7   : > { %p339_p3 = pnand %p913_p1, %p338_p2  ;;  %p32_p4 = scmp.ge.s32.totalorder %s1248_s11, 2 }
   0x8   : > { %p410_p5 = scmp.lt.s32.totalorder (!%p339_p3), %s1066_s27, 3  ;;  %p402_p6 = scmp.lt.s32.totalorder (!%p339_p3), %s1070_s28, 1  ;;  %v1084_v0 = vmov (!%p339_p3), 0.0   ;;  %vm1085_vm0 = vmmov (!%p339_p3), 0   ;;  %vm467_vm1 = vcmask (!%p339_p3), 261120   ;;  %vm643_vm2 = vcmask (!%p339_p3), 64512  }
   0x9   : > { %s1250_s11 = smov (%p32_p4, %s1248_s11), 0  ;;  %342 = sbr.rel (%p339_p3) target bundleno = 996 (0x3e4), region = 52 }
   0xa   : > { %964 = vmatprep.subr.bf16.mxu1 (!%p339_p3), %v1084_v0  ;;  %956 = vmatprep.subr.bf16.mxu0 (!%p339_p3), %v1084_v0  ;;  %vm707_vm3 = vcmask (!%p339_p3), 1043456   ;;  %vm752_vm4 = vcmask (!%p339_p3), 60416  }
   0xb   : > { %968 = vmatprep.mubr.msk.bf16.mxu1 (!%p339_p3), %vm1085_vm0, %v1084_v0  ;;  %960 = vmatprep.mubr.msk.bf16.mxu0 (!%p339_p3), %vm1085_vm0, %v1084_v0 }
  0x10   : > { %s1252_s27 = smov (!%p410_p5, %s1066_s27), 3  ;;  %s1254_s28 = smov (!%p402_p6, %s1070_s28), 1 }
  0x11   : > { %s940_s12 = sshll.u32 %s1252_s27, 4  ;;  %s1172_s19 = sshll.u32 %s1254_s28, 2 }
  0x12   : > { %s419_s15 = scalar_lea.vmem %s1235_s3, %s940_s12  ;;  %s414_s18 = scalar_lea.vmem %s1234_s2, %s940_s12 }
  0x13   : > { %v1034_v1 = vld [vmem:[%s419_s15] sm:$0xff]   ;;  %v1035_v2 = vld [vmem:[%s419_s15 + $0x8] sm:$0xff]   ;;  %s1177_s22 = scalar_lea.vmem %s1236_s4, %s940_s12  ;;  %s409_s25 = scalar_lea.vmem %s1233_s1, %s1172_s19 }
  0x14   : > { %965 = vmatpush3.bf16.msra.mxu1 %v1034_v1  ;;  %v1036_v3 = vld [vmem:[%s414_s18] sm:$0xff]   ;;  %v1037_v4 = vld [vmem:[%s414_s18 + $0x8] sm:$0xff]   ;;  %s405_s13 = scalar_lea.vmem %s1232_s0, %s1172_s19  ;;  %s430_s15 = scalar_lea.vmem %s1238_s6, %s1252_s27 }
  0x15   : > { %966 = vmatprep.subr.bf16.mxu1 %v1084_v0  ;;  %957 = vmatpush3.bf16.msra.mxu0 %v1036_v3  ;;  %v511_v5 = vld [vmem:[%s409_s25] sm:$0xf]  ;;  %s427_s18 = scalar_lea.vmem %s1237_s5, %s1252_s27  ;;  %v1039_v23 = vld [vmem:[%s1177_s22 + $0x8] sm:$0xff]   ;;  %s439_s23 = sadd.s32 %s1172_s19, %s1252_s27 }
  0x16   : > { %958 = vmatprep.subr.bf16.mxu0 %v1084_v0  ;;  %v443_v6 = vld [vmem:[%s405_s13] sm:$0xf]  ;;  %s923_s24 = sshll.u32 %s439_s23, 2 }
  0x17   : > { %v928_v7 = vld [vmem:[%s430_s15] ss:$0 sm:$0xff]  ;;  %s441_s28 = scalar_lea.vmem %s1240_s8, %s923_s24 }
  0x18   : > { %967 = vmatpush3.bf16.msra.mxu1 %v1035_v2  ;;  %v924_v12 = vld [vmem:[%s427_s18] ss:$0 sm:$0xff] }
  0x19   : > { %980 = vmatprep.subr.bf16.mxu1 %v1084_v0  ;;  %959 = vmatpush3.bf16.msra.mxu0 %v1037_v4  ;;  %v1038_v22 = vld [vmem:[%s1177_s22] sm:$0xff]   ;;  %s433_s22 = scalar_lea.vmem %s1239_s7, %s1252_s27 }
  0x1a   : > { %972 = vmatprep.subr.bf16.mxu0 %v1084_v0  ;;  %v932_v38 = vld [vmem:[%s433_s22] ss:$0 sm:$0xff] }
  0x1b   : > { %969 = vmatmul.mubr.msk.bf16.vlgmr.msra.gmra.mrb[0].mxu1 %vm467_vm1, %v511_v5 }
  0x1c   : > { %982 = vmatprep.mubr.msk.bf16.mxu1 %vm1085_vm0, %v1084_v0  ;;  %961 = vmatmul.mubr.msk.bf16.vlgmr.msra.gmra.mrb[0].mxu0 %vm467_vm1, %v443_v6 }
  0x1d   : > { %976 = vmatprep.mubr.msk.bf16.mxu0 %vm1085_vm0, %v1084_v0  ;;  %973 = vmatpush3.bf16.msra.mxu0 %v1038_v22 }
  0x1e   : > { %974 = vmatprep.subr.bf16.mxu0 %v1084_v0 }
  0x21   : > { %975 = vmatpush3.bf16.msra.mxu0 %v1039_v23 }
  0x22   : > { %986 = vmatprep.subr.bf16.mxu0 %v1084_v0 }
  0x24   : > { %977 = vmatmul.mubr.msk.bf16.vlgmr.msra.gmra.mrb[4].mxu0 %vm467_vm1, %v511_v5 }
  0x25   : > { %988 = vmatprep.mubr.msk.bf16.mxu0 %vm1085_vm0, %v1084_v0 }
  0xee   : > { %v572_v8 = vpop.f32.mrb[0].mxu1 }
  0xef   : > { %v573_v9 = vadd.f32 %v928_v7, %v572_v8  ;;  %v970_v10 = vpop.f32.mrb[1].mxu1  ;;  %v505_v13 = vpop.f32.mrb[0].mxu0 }
  0xf0   : > { %v575_v11 = vpop.f32.mrb[2].mxu1  ;;  %v962_v16 = vpop.f32.mrb[1].mxu0  ;;  %v506_v19 = vadd.f32 %v924_v12, %v505_v13 }
  0xf1   : > { %v642_v14 = vpack.c.bf16 %v573_v9, %v573_v9  ;;  %v971_v15 = vpop.f32.mrb[3].mxu1  ;;  %v508_v17 = vpop.f32.mrb[2].mxu0 }
  0xf2   : > { %v963_v20 = vpop.f32.mrb[3].mxu0  ;;  %v641_v21 = vpack.c.bf16 %v506_v19, %v506_v19 }
  0xf3   : > { %v648_v18 = vsel %vm643_vm2, %v642_v14, 0 }
  0xf4   : > { %981 = vmatpush3.bf16.xpose.msra.mxu1 %v648_v18 }
  0xf7   : > { %v635_v35 = vpop.f32.mrb[4].mxu0 }
  0xf8   : > { %v978_v36 = vpop.f32.mrb[5].mxu0  ;;  %v636_v40 = vadd.f32 %v932_v38, %v635_v35 }
  0xf9   : > { %v638_v37 = vpop.f32.mrb[6].mxu0 }
  0xfa   : > { %v979_v39 = vpop.f32.mrb[7].mxu0  ;;  %v703_v41 = vpack.c.bf16 %v636_v40, %v636_v40 }
  0xfb   : > { %983 = vmatmul.mubr.msk.bf16.vlgmr.msra.gmra.mrb[4].mxu1 %vm643_vm2, %v641_v21 }
  0xfc   : > { %v709_v42 = vsel %vm707_vm3, %v703_v41, 0 }
  0xfd   : > { %987 = vmatpush3.bf16.msra.mxu0 %v709_v42 }
 0x1ce   : > { %v684_v24 = vpop.f32.mrb[4].mxu1 }
 0x1cf   : > { %v690_v25 = vmul.f32 0.35355338, %v684_v24  ;;  %v984_v26 = vpop.f32.mrb[5].mxu1 }
 0x1d0   : > { %v687_v27 = vpop.f32.mrb[6].mxu1 }
 0x1d1   : > { %v985_v28 = vpop.f32.mrb[7].mxu1  ;;  %v691_v29 = vsel %vm643_vm2, %v690_v25, -inf }
 0x1d2   : > { %692 = vmax.xlane.f32.xlu0 %v691_v29 }
 0x25f   : > { %v693_v30 = vpop.xlane.xlu0 %692 }
 0x260   : > { %v694_v31 = vsub.f32 %v690_v25, %v693_v30 }
 0x262   : > { %v695_v32 = vmul.f32 1.442695, %v694_v31 }
 0x264   : > { %1040 = vpow2.f32 %v695_v32 }
 0x26e   : > { %v1041_v33 = vpop.eup %1040 }
 0x26f   : > { %v697_v34 = vsel %vm643_vm2, %v1041_v33, 0.0 }
 0x270   : > { %698 = vadd.xlane.f32.xlu0 %v697_v34 }
 0x2fd   : > { %v699_v43 = vpop.xlane.xlu0 %698 }
 0x2fe   : > { %1042 = vrcp.f32 %v699_v43 }
 0x308   : > { %v1043_v44 = vpop.eup %1042 }
 0x309   : > { %v701_v45 = vmul.f32 %v1043_v44, %v1041_v33 }
 0x30b   : > { %v702_v46 = vpack.c.bf16 %v701_v45, %v701_v45 }
 0x30d   : > { %989 = vmatmul.mubr.msk.bf16.vlgmr.msra.gmra.mrb[8].mxu0 %vm643_vm2, %v702_v46 }
 0x3e0   : > { %v745_v47 = vpop.f32.mrb[8].mxu0 }
 0x3e1   : > { %v751_v48 = vpack.c.bf16 %v745_v47, %v745_v47  ;;  %v990_v49 = vpop.f32.mrb[9].mxu0 }
 0x3e2   : > { %v748_v50 = vpop.f32.mrb[10].mxu0 }
 0x3e3   : > { %753 = vst.msk [vmem:[%s441_s28] sm:$0xf] %vm752_vm4, %v751_v48  ;;  %v991_v51 = vpop.f32.mrb[11].mxu0 }
 0x3e4 PF: > { %s18_s9 = sadd.s32 1, %s1082_s9   ;;  %s1241_s27 = smov %s1074_s29 }
 0x3e5   : > { %p15_p7 = scmp.ge.s32.totalorder %s18_s9, 10   ;;  %s1242_s28 = smov %s1078_s30 }
 0x3e6   : > { %s1243_s29 = smov %s1246_s10  ;;  %s1244_s30 = smov %s1250_s11 }
 0x3e7   :  { %17 = sbr.rel (!%p15_p7) target bundleno = 3 (0x3), region = 103 }

</bundles_post_ra>
